<compile_context>
chip_gen: v7x
topology: tpu7x:2x2x1
jax: 0.10.0
libtpu: 0.0.40
codegen_flags: <defaults>
</compile_context>

<pallas_src>
import math

import jax
import jax.numpy as jnp
from jax.experimental import pallas as pl
from jax.experimental.pallas import tpu as pltpu

NUM_LAYERS = 2          # nn.TransformerEncoder(num_layers=2)
NHEAD = 2               # nhead=2
INPUT_SIZE = 3          # self.input_size = 3
FF_DIM = 2048           # nn.TransformerEncoderLayer default dim_feedforward
LN_EPS = 1e-5           # nn.LayerNorm default eps
MXU_DTYPE = jnp.bfloat16  # storage/operand dtype for the big matmul weights

KERNEL_PARAM_ORDER = ["w_in", "b_in", "w_qkv", "b_qkv", "wo", "bo",
                      "ln1g", "ln1b", "w1", "b1", "w2", "b2", "ln2g", "ln2b"]


def _layer_norm(v, g, b):
    mu = jnp.mean(v, axis=-1, keepdims=True)
    var = jnp.mean((v - mu) ** 2, axis=-1, keepdims=True)
    return (v - mu) * jax.lax.rsqrt(var + LN_EPS) * g + b


def encoder_kernel(x_ref, rope_ref, w_in_ref, b_in_ref,
                   w_qkv_ref, b_qkv_ref, wo_ref, bo_ref,
                   ln1g_ref, ln1b_ref, w1_ref, b1_ref, w2_ref, b2_ref,
                   ln2g_ref, ln2b_ref, out_ref, h_ref):
    """One post-norm encoder layer per grid step for the single live timestep.

    The hidden state is carried across grid steps in the VMEM scratch `h_ref`.
    """
    H = w_in_ref.shape[1]
    hd = H // NHEAD
    layer = pl.program_id(0)

    # Layer 0 also performs input_proj + rotary multiply for timestep T-1.
    @pl.when(layer == 0)
    def _():
        h0 = jnp.dot(x_ref[...], w_in_ref[...],
                     preferred_element_type=jnp.float32) + b_in_ref[...]
        h_ref[...] = h0 * rope_ref[...]

    h = h_ref[...]                                                 # (A, H) f32

    # --- multi-head self-attention over the agent axis --------------------
    # Fused lane-dense QKV projection: single (A,H) x (H,3H) MXU matmul.
    # Column layout of w_qkv: [q | k | v], heads contiguous inside each block,
    # with the 1/sqrt(hd) scale already folded into the q columns.
    qkv = jnp.dot(h.astype(MXU_DTYPE), w_qkv_ref[...],
                  preferred_element_type=jnp.float32) + b_qkv_ref[...]   # (A, 3H)

    o_heads = []
    for n in range(NHEAD):
        q = qkv[:, n * hd:(n + 1) * hd]                            # (A, hd)
        k = qkv[:, H + n * hd:H + (n + 1) * hd]
        v = qkv[:, 2 * H + n * hd:2 * H + (n + 1) * hd]
        s = jax.lax.dot_general(q, k, (((1,), (1,)), ((), ())),
                                preferred_element_type=jnp.float32)  # (A, A)
        s = s - jnp.max(s, axis=-1, keepdims=True)
        e = jnp.exp(s)
        p = e * pl.reciprocal(jnp.sum(e, axis=-1, keepdims=True), approx=True)
        o_heads.append(jnp.dot(p, v, preferred_element_type=jnp.float32))
    o_cat = jnp.concatenate(o_heads, axis=-1)                      # concat-heads (A, H)
    att = jnp.dot(o_cat.astype(MXU_DTYPE), wo_ref[...],
                  preferred_element_type=jnp.float32) + bo_ref[...]
    # dropout is identity (deterministic / eval-mode forward)
    h = _layer_norm(h + att, ln1g_ref[...], ln1b_ref[...])

    # --- feed-forward: Linear -> ReLU -> Linear, post-norm -----------------
    ff = jnp.dot(h.astype(MXU_DTYPE), w1_ref[...],
                 preferred_element_type=jnp.float32) + b1_ref[...]
    ff = jnp.maximum(ff, 0.0)
    ff = jnp.dot(ff.astype(MXU_DTYPE), w2_ref[...],
                 preferred_element_type=jnp.float32) + b2_ref[...]
    h = _layer_norm(h + ff, ln2g_ref[...], ln2b_ref[...])

    h_ref[...] = h
    out_ref[...] = h.astype(out_ref.dtype)


def make_rope(T, H):
    """rotary_emb[:T] exactly as RotaryPositionEmbedding builds it."""
    pos = jnp.arange(T, dtype=jnp.float32)[:, None]
    idx = jnp.arange(0, H, 2, dtype=jnp.float32)
    div = jnp.exp(idx * (-jnp.log(jnp.float32(40.0)) / H))
    ang = pos * div                                                # (T, H//2)
    rope = jnp.zeros((T, H), jnp.float32)
    rope = rope.at[:, 0::2].set(jnp.sin(ang))
    rope = rope.at[:, 1::2].set(jnp.cos(ang))
    return rope


def init_params(key, H):
    """Deterministic synthetic parameters (shapes follow the PyTorch module)."""
    ks = jax.random.split(key, 14)

    def n(k, shape, s=0.05):
        return (s * jax.random.normal(k, shape)).astype(jnp.float32)

    L = NUM_LAYERS
    return dict(
        w_in=n(ks[0], (INPUT_SIZE, H)),          # Linear(3, H) weight^T
        b_in=n(ks[1], (1, H)),
        wq=n(ks[2], (L, H, H)),                  # in_proj split, pre-transposed
        wk=n(ks[3], (L, H, H)),
        wv=n(ks[4], (L, H, H)),
        bq=n(ks[5], (L, 1, H)),
        bk=n(ks[6], (L, 1, H)),
        bv=n(ks[7], (L, 1, H)),
        wo=n(ks[8], (L, H, H)),                  # out_proj (pre-transposed)
        bo=n(ks[9], (L, 1, H)),
        ln1g=jnp.ones((L, 1, H), jnp.float32),
        ln1b=jnp.zeros((L, 1, H), jnp.float32),
        w1=n(ks[10], (L, H, FF_DIM)),            # linear1
        b1=n(ks[11], (L, 1, FF_DIM)),
        w2=n(ks[12], (L, FF_DIM, H)),            # linear2
        b2=n(ks[13], (L, 1, H)),
        ln2g=jnp.ones((L, 1, H), jnp.float32),
        ln2b=jnp.zeros((L, 1, H), jnp.float32),
    )


def prepare_params(params):
    """Convert logical (PyTorch-layout) params into the kernel layout.

    - Q/K/V weights fused column-wise into w_qkv: (L, H, 3H) with column layout
      [q | k | v] (heads contiguous inside each H-wide block, matching the
      PyTorch head split of the projection output).
    - The attention scale 1/sqrt(head_dim) is folded into the Q columns.
    - The large matmul weights are stored in bfloat16 (MXU-native operand width;
      halves weight DMA); biases, layernorm params and all elementwise math
      stay float32.
    These transforms are mathematically equivalent to the original module.
    """
    L, H, _ = params["wq"].shape
    hd = H // NHEAD
    scale = 1.0 / math.sqrt(hd)

    w_qkv = jnp.concatenate(
        [params["wq"] * scale, params["wk"], params["wv"]], axis=-1)  # (L, H, 3H)
    b_qkv = jnp.concatenate(
        [params["bq"] * scale, params["bk"], params["bv"]], axis=-1)  # (L, 1, 3H)

    kp = {k: params[k] for k in ["w_in", "b_in", "bo", "ln1g", "ln1b",
                                 "b1", "b2", "ln2g", "ln2b"]}
    kp.update(
        w_qkv=w_qkv.astype(MXU_DTYPE),
        b_qkv=b_qkv,
        wo=params["wo"].astype(MXU_DTYPE),
        w1=params["w1"].astype(MXU_DTYPE),
        w2=params["w2"].astype(MXU_DTYPE),
    )
    return kp


def encoder_transformer_forward(transformer_in, agents_per_sample, params):
    """transformer_in: (A, T, 3) float32.  Returns (A, H) == out[:, -1, :]."""
    del agents_per_sample  # unused by the PyTorch forward as well
    A, T, _ = transformer_in.shape
    H = params["w_in"].shape[1]
    assert H % NHEAD == 0

    kp = prepare_params(params)

    # Only timestep T-1 reaches transformer_out[:, -1, :] (T is the transformer
    # batch axis), so compute just that one timestep.
    x_last = transformer_in[:, T - 1, :].astype(jnp.float32)      # (A, 3)
    rope_last = make_rope(T, H)[T - 1].reshape(1, H)              # (1, H)

    def const_spec(arr):
        nd = arr.ndim
        return pl.BlockSpec(arr.shape, lambda l, _nd=nd: (0,) * _nd)

    def per_layer_spec(arr):
        # (L, ...) params: squeeze the layer axis; grid index selects the layer,
        # so layer l+1 weights DMA while layer l computes (double-buffered).
        trailing = arr.shape[1:]
        nz = len(trailing)
        return pl.BlockSpec((None,) + trailing,
                            lambda l, _nz=nz: (l,) + (0,) * _nz)

    def spec_for(name, arr):
        return const_spec(arr) if name in ("w_in", "b_in") else per_layer_spec(arr)

    in_specs = [
        pl.BlockSpec((A, INPUT_SIZE), lambda l: (0, 0)),          # x_last
        pl.BlockSpec((1, H), lambda l: (0, 0)),                   # rope row
    ] + [spec_for(k, kp[k]) for k in KERNEL_PARAM_ORDER]

    # TODO(synk): if this forward runs per sample in a larger workload, add a
    # leading "parallel" sample grid axis so weights stay VMEM-resident and
    # v7x's second TensorCore is used; a single (A=8, T) call has no batch axis.
    out = pl.pallas_call(
        encoder_kernel,
        out_shape=jax.ShapeDtypeStruct((A, H), jnp.float32),
        grid_spec=pltpu.PrefetchScalarGridSpec(
            num_scalar_prefetch=0,
            grid=(NUM_LAYERS,),
            in_specs=in_specs,
            out_specs=pl.BlockSpec((A, H), lambda l: (0, 0)),
            scratch_shapes=[pltpu.VMEM((A, H), jnp.float32)],     # carried hidden
        ),
        compiler_params=pltpu.CompilerParams(
            dimension_semantics=("arbitrary",)),                  # layers are sequential
    )(x_last, rope_last, *[kp[k] for k in KERNEL_PARAM_ORDER])
    return out


def reference_forward(transformer_in, params):
    """Pure-JAX reference mirroring the PyTorch module (all T timesteps, f32)."""
    x = transformer_in.astype(jnp.float32)
    A, T, _ = x.shape
    H = params["w_in"].shape[1]
    hd = H // NHEAD

    h = jnp.einsum("atc,ch->ath", x, params["w_in"]) + params["b_in"]
    h = h * make_rope(T, H)[None]                  # rope over the T axis
    h = jnp.transpose(h, (1, 0, 2))                # (T, A, H): batch=T, seq=A
    for l in range(NUM_LAYERS):
        q = h @ params["wq"][l] + params["bq"][l]
        k = h @ params["wk"][l] + params["bk"][l]
        v = h @ params["wv"][l] + params["bv"][l]
        qh = q.reshape(T, A, NHEAD, hd)
        kh = k.reshape(T, A, NHEAD, hd)
        vh = v.reshape(T, A, NHEAD, hd)
        s = jnp.einsum("tand,tbnd->tnab", qh, kh) / math.sqrt(hd)
        p = jax.nn.softmax(s, axis=-1)
        o = jnp.einsum("tnab,tbnd->tand", p, vh).reshape(T, A, H)
        att = o @ params["wo"][l] + params["bo"][l]
        h = _layer_norm(h + att, params["ln1g"][l], params["ln1b"][l])
        ff = jax.nn.relu(h @ params["w1"][l] + params["b1"][l])
        ff = ff @ params["w2"][l] + params["b2"][l]
        h = _layer_norm(h + ff, params["ln2g"][l], params["ln2b"][l])
    return h[T - 1]                                # == transformer_out[:, -1, :]


if __name__ == "__main__":
    key = jax.random.PRNGKey(0)
    k_params, k_x = jax.random.split(key)

    A, T, H = 8, 8, 32            # agents, timesteps (<= rope max_len 40), latent_size
    params = init_params(k_params, H)
    transformer_in = jax.random.normal(k_x, (A, T, INPUT_SIZE), jnp.float32)
    agents_per_sample = [A]       # unused, kept for signature parity

    out = encoder_transformer_forward(transformer_in, agents_per_sample, params)
    out = jax.block_until_ready(out)
    assert out.shape == (A, H) and out.dtype == jnp.float32

    ref = jax.block_until_ready(reference_forward(transformer_in, params))
    max_err = float(jnp.max(jnp.abs(out - ref)))
    assert jnp.allclose(out, ref, atol=2e-2, rtol=2e-2), max_err

    print("KERNEL_OK")
</pallas_src>

<mosaic_0001>
module attributes {stable_mosaic.version = 11 : i64} {
  func.func @encoder_kernel(%arg0: i32, %arg1: memref<8x3xf32, #tpu.memory_space<vmem>>, %arg2: memref<1x32xf32, #tpu.memory_space<vmem>>, %arg3: memref<3x32xf32, #tpu.memory_space<vmem>>, %arg4: memref<1x32xf32, #tpu.memory_space<vmem>>, %arg5: memref<1x32x96xbf16, #tpu.memory_space<vmem>>, %arg6: memref<1x1x96xf32, #tpu.memory_space<vmem>>, %arg7: memref<1x32x32xbf16, #tpu.memory_space<vmem>>, %arg8: memref<1x1x32xf32, #tpu.memory_space<vmem>>, %arg9: memref<1x1x32xf32, #tpu.memory_space<vmem>>, %arg10: memref<1x1x32xf32, #tpu.memory_space<vmem>>, %arg11: memref<1x32x2048xbf16, #tpu.memory_space<vmem>>, %arg12: memref<1x1x2048xf32, #tpu.memory_space<vmem>>, %arg13: memref<1x2048x32xbf16, #tpu.memory_space<vmem>>, %arg14: memref<1x1x32xf32, #tpu.memory_space<vmem>>, %arg15: memref<1x1x32xf32, #tpu.memory_space<vmem>>, %arg16: memref<1x1x32xf32, #tpu.memory_space<vmem>>, %arg17: memref<8x32xf32, #tpu.memory_space<vmem>>, %arg18: memref<8x32xf32, #tpu.memory_space<vmem>>) attributes {dimension_semantics = [#tpu.dimension_semantics<arbitrary>], iteration_bounds = array<i64: 2>, scalar_prefetch = 0 : i64, scratch_operands = 1 : i64, tpu.core_type = #tpu.core_type<tc>, window_params = [{pipeline_mode = #tpu.pipeline_mode<synchronous>, transform_indices = @transform_0, window_bounds = array<i64: 8, 3>}, {pipeline_mode = #tpu.pipeline_mode<synchronous>, transform_indices = @transform_1, window_bounds = array<i64: 1, 32>}, {pipeline_mode = #tpu.pipeline_mode<synchronous>, transform_indices = @transform_2, window_bounds = array<i64: 3, 32>}, {pipeline_mode = #tpu.pipeline_mode<synchronous>, transform_indices = @transform_3, window_bounds = array<i64: 1, 32>}, {transform_indices = @transform_4, window_bounds = array<i64: 1, 32, 96>}, {transform_indices = @transform_5, window_bounds = array<i64: 1, 1, 96>}, {transform_indices = @transform_6, window_bounds = array<i64: 1, 32, 32>}, {transform_indices = @transform_7, window_bounds = array<i64: 1, 1, 32>}, {transform_indices = @transform_8, window_bounds = array<i64: 1, 1, 32>}, {transform_indices = @transform_9, window_bounds = array<i64: 1, 1, 32>}, {transform_indices = @transform_10, window_bounds = array<i64: 1, 32, 2048>}, {transform_indices = @transform_11, window_bounds = array<i64: 1, 1, 2048>}, {transform_indices = @transform_12, window_bounds = array<i64: 1, 2048, 32>}, {transform_indices = @transform_13, window_bounds = array<i64: 1, 1, 32>}, {transform_indices = @transform_14, window_bounds = array<i64: 1, 1, 32>}, {transform_indices = @transform_15, window_bounds = array<i64: 1, 1, 32>}, {pipeline_mode = #tpu.pipeline_mode<synchronous>, transform_indices = @transform_16, window_bounds = array<i64: 8, 32>}]} {
    %c0_i32 = arith.constant 0 : i32
    %0 = arith.cmpi eq, %arg0, %c0_i32 : i32
    %1 = arith.extui %0 : i1 to i32
    %c0_i32_0 = arith.constant 0 : i32
    %2 = arith.cmpi ne, %1, %c0_i32_0 : i32
    scf.if %2 {
      %c0_64 = arith.constant 0 : index
      %c0_65 = arith.constant 0 : index
      %125 = vector.load %arg1[%c0_64, %c0_65] : memref<8x3xf32, #tpu.memory_space<vmem>>, vector<8x3xf32>
      %c0_66 = arith.constant 0 : index
      %c0_67 = arith.constant 0 : index
      %126 = vector.load %arg3[%c0_66, %c0_67] : memref<3x32xf32, #tpu.memory_space<vmem>>, vector<3x32xf32>
      %cst_68 = arith.constant dense<0.000000e+00> : vector<8x32xf32>
      %127 = tpu.matmul %125, %126, %cst_68 {dimension_numbers = #tpu.dot_dimension_numbers<[1], [0], [0], [1], [0, 0, 1, 1], [], []>} : vector<8x3xf32>, vector<3x32xf32>, vector<8x32xf32> -> vector<8x32xf32>
      %c0_69 = arith.constant 0 : index
      %c0_70 = arith.constant 0 : index
      %128 = vector.load %arg4[%c0_69, %c0_70] : memref<1x32xf32, #tpu.memory_space<vmem>>, vector<1x32xf32>
      %129 = vector.broadcast %128 : vector<1x32xf32> to vector<8x32xf32>
      %130 = arith.addf %127, %129 : vector<8x32xf32>
      %c0_71 = arith.constant 0 : index
      %c0_72 = arith.constant 0 : index
      %131 = vector.load %arg2[%c0_71, %c0_72] : memref<1x32xf32, #tpu.memory_space<vmem>>, vector<1x32xf32>
      %132 = vector.broadcast %131 : vector<1x32xf32> to vector<8x32xf32>
      %133 = arith.mulf %130, %132 : vector<8x32xf32>
      %c0_73 = arith.constant 0 : index
      %c0_74 = arith.constant 0 : index
      %134 = vector.load %arg18[%c0_73, %c0_74] : memref<8x32xf32, #tpu.memory_space<vmem>>, vector<8x32xf32>
      tpu.vector_store %arg18[%c0_73, %c0_74], %133 {strides = array<i32>} : memref<8x32xf32, #tpu.memory_space<vmem>>, vector<8x32xf32>,
    } else {
    }
    %c0 = arith.constant 0 : index
    %c0_1 = arith.constant 0 : index
    %3 = vector.load %arg18[%c0, %c0_1] : memref<8x32xf32, #tpu.memory_space<vmem>>, vector<8x32xf32>
    %4 = arith.truncf %3 : vector<8x32xf32> to vector<8x32xbf16>
    %c0_2 = arith.constant 0 : index
    %c0_3 = arith.constant 0 : index
    %c0_4 = arith.constant 0 : index
    %5 = vector.load %arg5[%c0_2, %c0_3, %c0_4] : memref<1x32x96xbf16, #tpu.memory_space<vmem>>, vector<1x32x96xbf16>
    %6 = vector.shape_cast %5 : vector<1x32x96xbf16> to vector<32x96xbf16>
    %cst = arith.constant dense<0.000000e+00> : vector<8x96xf32>
    %7 = tpu.matmul %4, %6, %cst {dimension_numbers = #tpu.dot_dimension_numbers<[1], [0], [0], [1], [0, 0, 1, 1], [], []>} : vector<8x32xbf16>, vector<32x96xbf16>, vector<8x96xf32> -> vector<8x96xf32>
    %c0_5 = arith.constant 0 : index
    %c0_6 = arith.constant 0 : index
    %c0_7 = arith.constant 0 : index
    %8 = vector.load %arg6[%c0_5, %c0_6, %c0_7] : memref<1x1x96xf32, #tpu.memory_space<vmem>>, vector<1x1x96xf32>
    %9 = vector.shape_cast %8 : vector<1x1x96xf32> to vector<1x96xf32>
    %10 = vector.broadcast %9 : vector<1x96xf32> to vector<8x96xf32>
    %11 = arith.addf %7, %10 : vector<8x96xf32>
    %12 = vector.extract_strided_slice %11 {offsets = [0, 0], sizes = [8, 16], strides = [1, 1]} : vector<8x96xf32> to vector<8x16xf32>
    %13 = vector.extract_strided_slice %11 {offsets = [0, 32], sizes = [8, 16], strides = [1, 1]} : vector<8x96xf32> to vector<8x16xf32>
    %14 = vector.extract_strided_slice %11 {offsets = [0, 64], sizes = [8, 16], strides = [1, 1]} : vector<8x96xf32> to vector<8x16xf32>
    %cst_8 = arith.constant dense<0.000000e+00> : vector<8x8xf32>
    %15 = tpu.matmul %12, %13, %cst_8 {dimension_numbers = #tpu.dot_dimension_numbers<[1], [1], [0], [0], [0, 0, 1, 0], [], []>} : vector<8x16xf32>, vector<8x16xf32>, vector<8x8xf32> -> vector<8x8xf32>
    %cst_9 = arith.constant dense<0xFF800000> : vector<8xf32>
    %16 = vector.multi_reduction <maximumf>, %15, %cst_9 [1] : vector<8x8xf32> to vector<8xf32>
    %17 = vector.shape_cast %16 : vector<8xf32> to vector<8x1xf32>
    %18 = vector.broadcast %17 : vector<8x1xf32> to vector<8x8xf32>
    %19 = arith.subf %15, %18 : vector<8x8xf32>
    %20 = math.exp %19 : vector<8x8xf32>
    %cst_10 = arith.constant dense<0.000000e+00> : vector<8xf32>
    %21 = vector.multi_reduction <add>, %20, %cst_10 [1] : vector<8x8xf32> to vector<8xf32>
    %22 = vector.shape_cast %21 : vector<8xf32> to vector<8x1xf32>
    %23 = tpu.reciprocal %22 {approx = true} : vector<8x1xf32> -> vector<8x1xf32>
    %24 = vector.broadcast %23 : vector<8x1xf32> to vector<8x8xf32>
    %25 = arith.mulf %20, %24 : vector<8x8xf32>
    %cst_11 = arith.constant dense<0.000000e+00> : vector<8x16xf32>
    %26 = tpu.matmul %25, %14, %cst_11 {dimension_numbers = #tpu.dot_dimension_numbers<[1], [0], [0], [1], [0, 0, 1, 1], [], []>} : vector<8x8xf32>, vector<8x16xf32>, vector<8x16xf32> -> vector<8x16xf32>
    %27 = vector.extract_strided_slice %11 {offsets = [0, 16], sizes = [8, 16], strides = [1, 1]} : vector<8x96xf32> to vector<8x16xf32>
    %28 = vector.extract_strided_slice %11 {offsets = [0, 48], sizes = [8, 16], strides = [1, 1]} : vector<8x96xf32> to vector<8x16xf32>
    %29 = vector.extract_strided_slice %11 {offsets = [0, 80], sizes = [8, 16], strides = [1, 1]} : vector<8x96xf32> to vector<8x16xf32>
    %cst_12 = arith.constant dense<0.000000e+00> : vector<8x8xf32>
    %30 = tpu.matmul %27, %28, %cst_12 {dimension_numbers = #tpu.dot_dimension_numbers<[1], [1], [0], [0], [0, 0, 1, 0], [], []>} : vector<8x16xf32>, vector<8x16xf32>, vector<8x8xf32> -> vector<8x8xf32>
    %cst_13 = arith.constant dense<0xFF800000> : vector<8xf32>
    %31 = vector.multi_reduction <maximumf>, %30, %cst_13 [1] : vector<8x8xf32> to vector<8xf32>
    %32 = vector.shape_cast %31 : vector<8xf32> to vector<8x1xf32>
    %33 = vector.broadcast %32 : vector<8x1xf32> to vector<8x8xf32>
    %34 = arith.subf %30, %33 : vector<8x8xf32>
    %35 = math.exp %34 : vector<8x8xf32>
    %cst_14 = arith.constant dense<0.000000e+00> : vector<8xf32>
    %36 = vector.multi_reduction <add>, %35, %cst_14 [1] : vector<8x8xf32> to vector<8xf32>
    %37 = vector.shape_cast %36 : vector<8xf32> to vector<8x1xf32>
    %38 = tpu.reciprocal %37 {approx = true} : vector<8x1xf32> -> vector<8x1xf32>
    %39 = vector.broadcast %38 : vector<8x1xf32> to vector<8x8xf32>
    %40 = arith.mulf %35, %39 : vector<8x8xf32>
    %cst_15 = arith.constant dense<0.000000e+00> : vector<8x16xf32>
    %41 = tpu.matmul %40, %29, %cst_15 {dimension_numbers = #tpu.dot_dimension_numbers<[1], [0], [0], [1], [0, 0, 1, 1], [], []>} : vector<8x8xf32>, vector<8x16xf32>, vector<8x16xf32> -> vector<8x16xf32>
    %42 = tpu.concatenate %26, %41 in 1 : vector<8x16xf32>, vector<8x16xf32> -> vector<8x32xf32>
    %43 = arith.truncf %42 : vector<8x32xf32> to vector<8x32xbf16>
    %c0_16 = arith.constant 0 : index
    %c0_17 = arith.constant 0 : index
    %c0_18 = arith.constant 0 : index
    %44 = vector.load %arg7[%c0_16, %c0_17, %c0_18] : memref<1x32x32xbf16, #tpu.memory_space<vmem>>, vector<1x32x32xbf16>
    %45 = vector.shape_cast %44 : vector<1x32x32xbf16> to vector<32x32xbf16>
    %cst_19 = arith.constant dense<0.000000e+00> : vector<8x32xf32>
    %46 = tpu.matmul %43, %45, %cst_19 {dimension_numbers = #tpu.dot_dimension_numbers<[1], [0], [0], [1], [0, 0, 1, 1], [], []>} : vector<8x32xbf16>, vector<32x32xbf16>, vector<8x32xf32> -> vector<8x32xf32>
    %c0_20 = arith.constant 0 : index
    %c0_21 = arith.constant 0 : index
    %c0_22 = arith.constant 0 : index
    %47 = vector.load %arg8[%c0_20, %c0_21, %c0_22] : memref<1x1x32xf32, #tpu.memory_space<vmem>>, vector<1x1x32xf32>
    %48 = vector.shape_cast %47 : vector<1x1x32xf32> to vector<1x32xf32>
    %49 = vector.broadcast %48 : vector<1x32xf32> to vector<8x32xf32>
    %50 = arith.addf %46, %49 : vector<8x32xf32>
    %51 = arith.addf %3, %50 : vector<8x32xf32>
    %c0_23 = arith.constant 0 : index
    %c0_24 = arith.constant 0 : index
    %c0_25 = arith.constant 0 : index
    %52 = vector.load %arg9[%c0_23, %c0_24, %c0_25] : memref<1x1x32xf32, #tpu.memory_space<vmem>>, vector<1x1x32xf32>
    %53 = vector.shape_cast %52 : vector<1x1x32xf32> to vector<1x32xf32>
    %c0_26 = arith.constant 0 : index
    %c0_27 = arith.constant 0 : index
    %c0_28 = arith.constant 0 : index
    %54 = vector.load %arg10[%c0_26, %c0_27, %c0_28] : memref<1x1x32xf32, #tpu.memory_space<vmem>>, vector<1x1x32xf32>
    %55 = vector.shape_cast %54 : vector<1x1x32xf32> to vector<1x32xf32>
    %cst_29 = arith.constant dense<0.000000e+00> : vector<8xf32>
    %56 = vector.multi_reduction <add>, %51, %cst_29 [1] : vector<8x32xf32> to vector<8xf32>
    %57 = vector.shape_cast %56 : vector<8xf32> to vector<8x1xf32>
    %cst_30 = arith.constant 3.200000e+01 : f32
    %58 = vector.broadcast %cst_30 : f32 to vector<8x1xf32>
    %59 = arith.divf %57, %58 : vector<8x1xf32>
    %60 = vector.broadcast %59 : vector<8x1xf32> to vector<8x32xf32>
    %61 = arith.subf %51, %60 : vector<8x32xf32>
    %62 = arith.mulf %61, %61 : vector<8x32xf32>
    %cst_31 = arith.constant dense<0.000000e+00> : vector<8xf32>
    %63 = vector.multi_reduction <add>, %62, %cst_31 [1] : vector<8x32xf32> to vector<8xf32>
    %64 = vector.shape_cast %63 : vector<8xf32> to vector<8x1xf32>
    %cst_32 = arith.constant 3.200000e+01 : f32
    %65 = vector.broadcast %cst_32 : f32 to vector<8x1xf32>
    %66 = arith.divf %64, %65 : vector<8x1xf32>
    %67 = vector.broadcast %59 : vector<8x1xf32> to vector<8x32xf32>
    %68 = arith.subf %51, %67 : vector<8x32xf32>
    %cst_33 = arith.constant 9.99999974E-6 : f32
    %69 = vector.broadcast %cst_33 : f32 to vector<8x1xf32>
    %70 = arith.addf %66, %69 : vector<8x1xf32>
    %71 = math.rsqrt %70 : vector<8x1xf32>
    %72 = vector.broadcast %71 : vector<8x1xf32> to vector<8x32xf32>
    %73 = arith.mulf %68, %72 : vector<8x32xf32>
    %74 = vector.broadcast %53 : vector<1x32xf32> to vector<8x32xf32>
    %75 = arith.mulf %73, %74 : vector<8x32xf32>
    %76 = vector.broadcast %55 : vector<1x32xf32> to vector<8x32xf32>
    %77 = arith.addf %75, %76 : vector<8x32xf32>
    %78 = arith.truncf %77 : vector<8x32xf32> to vector<8x32xbf16>
    %c0_34 = arith.constant 0 : index
    %c0_35 = arith.constant 0 : index
    %c0_36 = arith.constant 0 : index
    %79 = vector.load %arg11[%c0_34, %c0_35, %c0_36] : memref<1x32x2048xbf16, #tpu.memory_space<vmem>>, vector<1x32x2048xbf16>
    %80 = vector.shape_cast %79 : vector<1x32x2048xbf16> to vector<32x2048xbf16>
    %cst_37 = arith.constant dense<0.000000e+00> : vector<8x2048xf32>
    %81 = tpu.matmul %78, %80, %cst_37 {dimension_numbers = #tpu.dot_dimension_numbers<[1], [0], [0], [1], [0, 0, 1, 1], [], []>} : vector<8x32xbf16>, vector<32x2048xbf16>, vector<8x2048xf32> -> vector<8x2048xf32>
    %c0_38 = arith.constant 0 : index
    %c0_39 = arith.constant 0 : index
    %c0_40 = arith.constant 0 : index
    %82 = vector.load %arg12[%c0_38, %c0_39, %c0_40] : memref<1x1x2048xf32, #tpu.memory_space<vmem>>, vector<1x1x2048xf32>
    %83 = vector.shape_cast %82 : vector<1x1x2048xf32> to vector<1x2048xf32>
    %84 = vector.broadcast %83 : vector<1x2048xf32> to vector<8x2048xf32>
    %85 = arith.addf %81, %84 : vector<8x2048xf32>
    %cst_41 = arith.constant 0.000000e+00 : f32
    %86 = vector.broadcast %cst_41 : f32 to vector<8x2048xf32>
    %87 = arith.maximumf %85, %86 : vector<8x2048xf32>
    %88 = arith.truncf %87 : vector<8x2048xf32> to vector<8x2048xbf16>
    %c0_42 = arith.constant 0 : index
    %c0_43 = arith.constant 0 : index
    %c0_44 = arith.constant 0 : index
    %89 = vector.load %arg13[%c0_42, %c0_43, %c0_44] : memref<1x2048x32xbf16, #tpu.memory_space<vmem>>, vector<1x2048x32xbf16>
    %90 = vector.shape_cast %89 : vector<1x2048x32xbf16> to vector<2048x32xbf16>
    %cst_45 = arith.constant dense<0.000000e+00> : vector<8x32xf32>
    %91 = tpu.matmul %88, %90, %cst_45 {dimension_numbers = #tpu.dot_dimension_numbers<[1], [0], [0], [1], [0, 0, 1, 1], [], []>} : vector<8x2048xbf16>, vector<2048x32xbf16>, vector<8x32xf32> -> vector<8x32xf32>
    %c0_46 = arith.constant 0 : index
    %c0_47 = arith.constant 0 : index
    %c0_48 = arith.constant 0 : index
    %92 = vector.load %arg14[%c0_46, %c0_47, %c0_48] : memref<1x1x32xf32, #tpu.memory_space<vmem>>, vector<1x1x32xf32>
    %93 = vector.shape_cast %92 : vector<1x1x32xf32> to vector<1x32xf32>
    %94 = vector.broadcast %93 : vector<1x32xf32> to vector<8x32xf32>
    %95 = arith.addf %91, %94 : vector<8x32xf32>
    %96 = arith.addf %77, %95 : vector<8x32xf32>
    %c0_49 = arith.constant 0 : index
    %c0_50 = arith.constant 0 : index
    %c0_51 = arith.constant 0 : index
    %97 = vector.load %arg15[%c0_49, %c0_50, %c0_51] : memref<1x1x32xf32, #tpu.memory_space<vmem>>, vector<1x1x32xf32>
    %98 = vector.shape_cast %97 : vector<1x1x32xf32> to vector<1x32xf32>
    %c0_52 = arith.constant 0 : index
    %c0_53 = arith.constant 0 : index
    %c0_54 = arith.constant 0 : index
    %99 = vector.load %arg16[%c0_52, %c0_53, %c0_54] : memref<1x1x32xf32, #tpu.memory_space<vmem>>, vector<1x1x32xf32>
    %100 = vector.shape_cast %99 : vector<1x1x32xf32> to vector<1x32xf32>
    %cst_55 = arith.constant dense<0.000000e+00> : vector<8xf32>
    %101 = vector.multi_reduction <add>, %96, %cst_55 [1] : vector<8x32xf32> to vector<8xf32>
    %102 = vector.shape_cast %101 : vector<8xf32> to vector<8x1xf32>
    %cst_56 = arith.constant 3.200000e+01 : f32
    %103 = vector.broadcast %cst_56 : f32 to vector<8x1xf32>
    %104 = arith.divf %102, %103 : vector<8x1xf32>
    %105 = vector.broadcast %104 : vector<8x1xf32> to vector<8x32xf32>
    %106 = arith.subf %96, %105 : vector<8x32xf32>
    %107 = arith.mulf %106, %106 : vector<8x32xf32>
    %cst_57 = arith.constant dense<0.000000e+00> : vector<8xf32>
    %108 = vector.multi_reduction <add>, %107, %cst_57 [1] : vector<8x32xf32> to vector<8xf32>
    %109 = vector.shape_cast %108 : vector<8xf32> to vector<8x1xf32>
    %cst_58 = arith.constant 3.200000e+01 : f32
    %110 = vector.broadcast %cst_58 : f32 to vector<8x1xf32>
    %111 = arith.divf %109, %110 : vector<8x1xf32>
    %112 = vector.broadcast %104 : vector<8x1xf32> to vector<8x32xf32>
    %113 = arith.subf %96, %112 : vector<8x32xf32>
    %cst_59 = arith.constant 9.99999974E-6 : f32
    %114 = vector.broadcast %cst_59 : f32 to vector<8x1xf32>
    %115 = arith.addf %111, %114 : vector<8x1xf32>
    %116 = math.rsqrt %115 : vector<8x1xf32>
    %117 = vector.broadcast %116 : vector<8x1xf32> to vector<8x32xf32>
    %118 = arith.mulf %113, %117 : vector<8x32xf32>
    %119 = vector.broadcast %98 : vector<1x32xf32> to vector<8x32xf32>
    %120 = arith.mulf %118, %119 : vector<8x32xf32>
    %121 = vector.broadcast %100 : vector<1x32xf32> to vector<8x32xf32>
    %122 = arith.addf %120, %121 : vector<8x32xf32>
    %c0_60 = arith.constant 0 : index
    %c0_61 = arith.constant 0 : index
    %123 = vector.load %arg18[%c0_60, %c0_61] : memref<8x32xf32, #tpu.memory_space<vmem>>, vector<8x32xf32>
    tpu.vector_store %arg18[%c0_60, %c0_61], %122 {strides = array<i32>} : memref<8x32xf32, #tpu.memory_space<vmem>>, vector<8x32xf32>,
    %c0_62 = arith.constant 0 : index
    %c0_63 = arith.constant 0 : index
    %124 = vector.load %arg17[%c0_62, %c0_63] : memref<8x32xf32, #tpu.memory_space<vmem>>, vector<8x32xf32>
    tpu.vector_store %arg17[%c0_62, %c0_63], %122 {strides = array<i32>} : memref<8x32xf32, #tpu.memory_space<vmem>>, vector<8x32xf32>,
    return
  }
  func.func @transform_0(%arg0: i32) -> (i32, i32) {
    %c0_i32 = arith.constant 0 : i32
    %c0_i32_0 = arith.constant 0 : i32
    %c0_i32_1 = arith.constant 0 : i32
    return %c0_i32, %c0_i32_0 : i32, i32
  }
  func.func @transform_1(%arg0: i32) -> (i32, i32) {
    %c0_i32 = arith.constant 0 : i32
    %c0_i32_0 = arith.constant 0 : i32
    %c0_i32_1 = arith.constant 0 : i32
    return %c0_i32, %c0_i32_0 : i32, i32
  }
  func.func @transform_2(%arg0: i32) -> (i32, i32) {
    %c0_i32 = arith.constant 0 : i32
    %c0_i32_0 = arith.constant 0 : i32
    %c0_i32_1 = arith.constant 0 : i32
    return %c0_i32, %c0_i32_0 : i32, i32
  }
  func.func @transform_3(%arg0: i32) -> (i32, i32) {
    %c0_i32 = arith.constant 0 : i32
    %c0_i32_0 = arith.constant 0 : i32
    %c0_i32_1 = arith.constant 0 : i32
    return %c0_i32, %c0_i32_0 : i32, i32
  }
  func.func @transform_4(%arg0: i32) -> (i32, i32, i32) {
    %c0_i32 = arith.constant 0 : i32
    %c0_i32_0 = arith.constant 0 : i32
    %c0_i32_1 = arith.constant 0 : i32
    return %arg0, %c0_i32, %c0_i32_0 : i32, i32, i32
  }
  func.func @transform_5(%arg0: i32) -> (i32, i32, i32) {
    %c0_i32 = arith.constant 0 : i32
    %c0_i32_0 = arith.constant 0 : i32
    %c0_i32_1 = arith.constant 0 : i32
    return %arg0, %c0_i32, %c0_i32_0 : i32, i32, i32
  }
  func.func @transform_6(%arg0: i32) -> (i32, i32, i32) {
    %c0_i32 = arith.constant 0 : i32
    %c0_i32_0 = arith.constant 0 : i32
    %c0_i32_1 = arith.constant 0 : i32
    return %arg0, %c0_i32, %c0_i32_0 : i32, i32, i32
  }
  func.func @transform_7(%arg0: i32) -> (i32, i32, i32) {
    %c0_i32 = arith.constant 0 : i32
    %c0_i32_0 = arith.constant 0 : i32
    %c0_i32_1 = arith.constant 0 : i32
    return %arg0, %c0_i32, %c0_i32_0 : i32, i32, i32
  }
  func.func @transform_8(%arg0: i32) -> (i32, i32, i32) {
    %c0_i32 = arith.constant 0 : i32
    %c0_i32_0 = arith.constant 0 : i32
    %c0_i32_1 = arith.constant 0 : i32
    return %arg0, %c0_i32, %c0_i32_0 : i32, i32, i32
  }
  func.func @transform_9(%arg0: i32) -> (i32, i32, i32) {
    %c0_i32 = arith.constant 0 : i32
    %c0_i32_0 = arith.constant 0 : i32
    %c0_i32_1 = arith.constant 0 : i32
    return %arg0, %c0_i32, %c0_i32_0 : i32, i32, i32
  }
  func.func @transform_10(%arg0: i32) -> (i32, i32, i32) {
    %c0_i32 = arith.constant 0 : i32
    %c0_i32_0 = arith.constant 0 : i32
    %c0_i32_1 = arith.constant 0 : i32
    return %arg0, %c0_i32, %c0_i32_0 : i32, i32, i32
  }
  func.func @transform_11(%arg0: i32) -> (i32, i32, i32) {
    %c0_i32 = arith.constant 0 : i32
    %c0_i32_0 = arith.constant 0 : i32
    %c0_i32_1 = arith.constant 0 : i32
    return %arg0, %c0_i32, %c0_i32_0 : i32, i32, i32
  }
  func.func @transform_12(%arg0: i32) -> (i32, i32, i32) {
    %c0_i32 = arith.constant 0 : i32
    %c0_i32_0 = arith.constant 0 : i32
    %c0_i32_1 = arith.constant 0 : i32
    return %arg0, %c0_i32, %c0_i32_0 : i32, i32, i32
  }
  func.func @transform_13(%arg0: i32) -> (i32, i32, i32) {
    %c0_i32 = arith.constant 0 : i32
    %c0_i32_0 = arith.constant 0 : i32
    %c0_i32_1 = arith.constant 0 : i32
    return %arg0, %c0_i32, %c0_i32_0 : i32, i32, i32
  }
  func.func @transform_14(%arg0: i32) -> (i32, i32, i32) {
    %c0_i32 = arith.constant 0 : i32
    %c0_i32_0 = arith.constant 0 : i32
    %c0_i32_1 = arith.constant 0 : i32
    return %arg0, %c0_i32, %c0_i32_0 : i32, i32, i32
  }
  func.func @transform_15(%arg0: i32) -> (i32, i32, i32) {
    %c0_i32 = arith.constant 0 : i32
    %c0_i32_0 = arith.constant 0 : i32
    %c0_i32_1 = arith.constant 0 : i32
    return %arg0, %c0_i32, %c0_i32_0 : i32, i32, i32
  }
  func.func @transform_16(%arg0: i32) -> (i32, i32) {
    %c0_i32 = arith.constant 0 : i32
    %c0_i32_0 = arith.constant 0 : i32
    %c0_i32_1 = arith.constant 0 : i32
    return %c0_i32, %c0_i32_0 : i32, i32
  }
}

</mosaic_0001>

<bundles_post_ra>
// kernel: tpu_custom_call.1
= control target key start
LH: loop header
LB: loop body
LE: loop exit
PB: predicated region body
PF: predicated region fallthrough
CT: control target
= control target key end

     0   :  { %s4681_s0 = inlined_call_operand.vmem [shape: f32[8,3], index: 0, kind: input, shape index: {}]   ;;  %s4682_s1 = inlined_call_operand.vmem [shape: f32[1,32], index: 1, kind: input, shape index: {}]   ;;  %s4683_s2 = inlined_call_operand.vmem [shape: f32[3,32], index: 2, kind: input, shape index: {}]   ;;  %s4684_s3 = inlined_call_operand.vmem [shape: f32[1,32], index: 3, kind: input, shape index: {}]   ;;  %s4685_s4 = inlined_call_operand.vmem [shape: bf16[2,32,96], index: 4, kind: input, shape index: {}]   ;;  %s4686_s5 = inlined_call_operand.vmem [shape: f32[2,1,96], index: 5, kind: input, shape index: {}]   ;;  %s4687_s6 = inlined_call_operand.vmem [shape: bf16[2,32,32], index: 6, kind: input, shape index: {}]   ;;  %s4688_s7 = inlined_call_operand.vmem [shape: f32[2,1,32], index: 7, kind: input, shape index: {}]   ;;  %s4689_s8 = inlined_call_operand.vmem [shape: f32[2,1,32], index: 8, kind: input, shape index: {}]   ;;  %s4690_s9 = inlined_call_operand.vmem [shape: f32[2,1,32], index: 9, kind: input, shape index: {}]   ;;  %s4691_s10 = inlined_call_operand.vmem [shape: bf16[2,32,2048], index: 10, kind: input, shape index: {}]   ;;  %s4692_s11 = inlined_call_operand.vmem [shape: f32[2,1,2048], index: 11, kind: input, shape index: {}]   ;;  %s4693_s12 = inlined_call_operand.vmem [shape: bf16[2,2048,32], index: 12, kind: input, shape index: {}]   ;;  %s4694_s13 = inlined_call_operand.vmem [shape: f32[2,1,32], index: 13, kind: input, shape index: {}]   ;;  %s4695_s14 = inlined_call_operand.vmem [shape: f32[2,1,32], index: 14, kind: input, shape index: {}]   ;;  %s4696_s15 = inlined_call_operand.vmem [shape: f32[2,1,32], index: 15, kind: input, shape index: {}]   ;;  %s4697_s16 = inlined_call_operand.hbm [shape: f32[8,32], index: 16, kind: output, shape index: {}]  }
   0x1   :  { %4700 = sst [smem:[#allocation7_spill]] %s4681_s0 }
   0x2   :  { %4701 = sst [smem:[#allocation8_spill]] %s4682_s1 }
   0x3   :  { %4702 = sst [smem:[#allocation9_spill]] %s4684_s3 }
   0x4   :  { %4703 = sst [smem:[#allocation10_spill]] %s4685_s4 }
   0x5   :  { %4704 = sst [smem:[#allocation11_spill]] %s4686_s5 }
   0x6   :  { %4705 = sst [smem:[#allocation12_spill]] %s4687_s6 }
   0x7   :  { %4706 = sst [smem:[#allocation13_spill]] %s4697_s16 }
   0x8   :  { %21 = vsyncpa [#allocation4], 0  ;;  %s4219_s21 = smov 0  }
   0x9 LB: > { %4707 = sst [smem:[#allocation6_spill]] %s4120_s21  ;;  %s4225_s22 = sadd.s32 4294967295, %s4120_s21   ;;  %s4120_s21 = sphi %s4219_s21, %s27_s21  }
   0xa   : > { %p3471_p0 = scmp.ge.s32.totalorder %s4120_s21, 1  ;;  %p553_p1 = scmp.lt.s32.totalorder %s4120_s21, 3 }
   0xc   : > { %p554_p2 = pnand %p3471_p0, %p553_p1 }
   0xd   : > { %p638_p3 = scmp.lt.s32.totalorder (!%p554_p2), %s4225_s22, 1  ;;  %s4709_s4 = sld [smem:[#allocation10_spill]] (!%p554_p2) }
   0xe   : > { %557 = sbr.rel (%p554_p2) target bundleno = 3381 (0xd35), region = 84  ;;  %s4710_s6 = sld [smem:[#allocation12_spill]] (!%p554_p2) }
   0xf   : > { %p3481_p4 = scmp.ne.s32.totalorder (!%p554_p2), %s4225_s22, 0 }
  0x15   : > { %s4231_s23 = scalar_select %p638_p3, %s4225_s22, 1 }
  0x16   : > { %687 = sbr.rel (%p3481_p4) target bundleno = 252 (0xfc), region = 88  ;;  %v689_v0 = vld [vmem:[%s4683_s2] sm:$0x7] (!%p3481_p4)  ;;  %vm701_vm0 = vcmask (!%p3481_p4), 1042432   ;;  %v4122_v2 = vmov (!%p3481_p4), 0.0   ;;  %vm4123_vm1 = vmmov (!%p3481_p4), 0  }
  0x17   : > { %s3677_s24 = sshll.u32 %s4231_s23, 4  ;;  %s3679_s28 = sshll.u32 %s4231_s23, 8  ;;  %3873 = vmatprep.subr.mxu0 (!%p3481_p4), %v4122_v2  ;;  %3875 = vmatprep.mubr.msk.f32.mxu0 (!%p3481_p4), %vm4123_vm1, %v4122_v2  ;;  %vm697_vm2 = vcmask (!%p3481_p4), 23552   ;;  %vm783_vm3 = vcmask (!%p3481_p4), 261120  }
  0x18   : > { %s4241_s30 = scalar_lea.vmem %s4709_s4, %s3677_s24  ;;  %s4246_s18 = scalar_lea.vmem %s4710_s6, %s3677_s24  ;;  %3874 = vmatpush3.msk.msra.mxu0 (!%p3481_p4), %vm701_vm0, %v689_v0 }
  0x19   : > { %s4264_s5 = scalar_lea.vmem %s4691_s10, %s3679_s28  ;;  %s4269_s6 = scalar_lea.vmem %s4692_s11, %s3677_s24 }
  0x1a   : > { %s3680_s19 = sshll.u32 %s4231_s23, 10  ;;  %s676_s1 = scalar_lea.vmem %s4694_s13, %s4231_s23 }
  0x1b   : > { %s4279_s25 = scalar_lea.vmem %s4693_s12, %s3680_s19  ;;  %s679_s4 = scalar_lea.vmem %s4695_s14, %s4231_s23 }
  0x1c   : > { %s682_s0 = scalar_lea.vmem %s4696_s15, %s4231_s23  ;;  %s4711_s19 = sld [smem:[#allocation7_spill]] (!%p3481_p4) }
  0x1d   : > { %s4712_s16 = sld [smem:[#allocation9_spill]]  ;;  %s4713_s29 = sld [smem:[#allocation8_spill]] }
  0x22   : > { %v688_v1 = vld [vmem:[%s4711_s19] sm:$0xff] }
  0x23   : > { %3876 = vmatmul.mubr.msk.f32.vlgmr.msra.gmra.mrb[0].mxu0 %vm697_vm2, %v688_v1  ;;  %v3482_v3 = vld [vmem:[%s4712_s16] ss:$0 sm:$0xff] }
  0x24   : > { %v3485_v5 = vld [vmem:[%s4713_s29] ss:$0 sm:$0xff] }
  0xf6   : > { %v771_v4 = vpop.f32.mrb[0].mxu0 }
  0xf7   : > { %v772_v6 = vadd.f32 %v3482_v3, %v771_v4  ;;  %v3877_v7 = vpop.f32.mrb[1].mxu0 }
  0xf9   : > { %v782_v8 = vmul.f32 %v3485_v5, %v772_v6 }
  0xfb   : > { %784 = vst.msk [vmem:[#allocation2] sm:$0xff] %vm783_vm3, %v782_v8 }
  0xfc PF: > { %v3940_v9 = vld [vmem:[%s4241_s30] sm:$0xff]   ;;  %v4124_v10 = vmov 0.0   ;;  %v3941_v11 = vld [vmem:[%s4241_s30 + $0x8] sm:$0xff]   ;;  %vm4125_vm4 = vmmov 0   ;;  %vm810_vm5 = vcmask 261120   ;;  %s4714_s17 = sld [smem:[#allocation11_spill]]  ;;  %s4716_s30 = scalar_lea.vmem %s4688_s7, %s4231_s23 }
  0xfd   : > { %3878 = vmatprep.subr.bf16.mxu0 %v4124_v10  ;;  %3886 = vmatprep.subr.mxu1 %v4124_v10  ;;  %s4126_s3 = smov 64   ;;  %s4127_s19 = smov 96   ;;  %vm857_vm6 = vcmask 130048   ;;  %vm932_vm7 = vcmask 64512   ;;  %v3942_v49 = vld [vmem:[%s4246_s18] sm:$0xff]   ;;  %v3943_v50 = vld [vmem:[%s4246_s18 + $0x8] sm:$0xff]  }
  0xfe   : > { %3879 = vmatpush3.bf16.msra.mxu0 %v3940_v9  ;;  %3882 = vmatprep.mubr.msk.bf16.mxu0 %vm4125_vm4, %v4124_v10  ;;  %s4128_s27 = smov 80   ;;  %s4129_s20 = smov 112   ;;  %v3496_v56 = vld [vmem:[%s4716_s30] ss:$0 sm:$0xff]  ;;  %v1290_v7 = vld [vmem:[%s4264_s5 + $0x8] sm:$0xff] }
  0xff   : > { %3880 = vmatprep.subr.bf16.mxu0 %v4124_v10  ;;  %3888 = vmatprep.mubr.msk.f32.mxu1 %vm4125_vm4, %v4124_v10  ;;  %s4130_s16 = smov 48   ;;  %s4131_s26 = smov 16   ;;  %v1289_v5 = vld [vmem:[%s4264_s5] sm:$0xff]  ;;  %v1298_v9 = vld [vmem:[%s4264_s5 + $0x48] sm:$0xff] }
 0x100   : > { %v1297_v6 = vld [vmem:[%s4264_s5 + $0x40] sm:$0xff]  ;;  %p3918_p5 = scmp.eq.s32.totalorder %s4225_s22, 1 }
 0x101   : > { %v3503_v8 = vcombine.high %v1289_v5, %v1297_v6 }
 0x102   : > { %v4308_v12 = vld [vmem:[#allocation2] sm:$0xff]  ;;  %3881 = vmatpush3.bf16.msra.mxu0 %v3941_v11  ;;  %s4715_s21 = scalar_lea.vmem %s4714_s17, %s4231_s23  ;;  %v3504_v11 = vcombine.low %v1290_v7, %v1298_v9  ;;  %s4717_s17 = scalar_lea.vmem %s4689_s8, %s4231_s23 }
 0x103   : > { %v786_v13 = vpack.c.bf16 %v4308_v12, %v4308_v12  ;;  %3901 = vmatprep.subr.mxu0 %v4124_v10  ;;  %v3486_v14 = vld [vmem:[%s4715_s21] ss:$0 sm:$0xff] }
 0x105   : > { %3883 = vmatmul.mubr.msk.bf16.vlgmr.msra.gmra.mrb[0].mxu0 %vm810_vm5, %v786_v13  ;;  %v1305_v13 = vld [vmem:[%s4264_s5 + $0x80] sm:$0xff] }
 0x106   : > { %3903 = vmatprep.mubr.msk.f32.mxu0 %vm4125_vm4, %v4124_v10 }
 0x1d8   : > { %v848_v15 = vpop.f32.mrb[0].mxu0 }
 0x1d9   : > { %v849_v16 = vadd.f32 %v3486_v14, %v848_v15  ;;  %v3884_v17 = vpop.f32.mrb[1].mxu0  ;;  %v1313_v14 = vld [vmem:[%s4264_s5 + $0xc0] sm:$0xff]  ;;  %v1306_v15 = vld [vmem:[%s4264_s5 + $0x88] sm:$0xff] }
 0x1da   : > { %v851_v18 = vpop.f32.mrb[2].mxu0  ;;  %v1314_v17 = vld [vmem:[%s4264_s5 + $0xc8] sm:$0xff] }
 0x1db   : > { %944 = vrot.lane.b32.xlu1 %v849_v16, %s4126_s3  ;;  %855 = vrot.lane.b32.xlu0 %v849_v16, %s4127_s19  ;;  %v3885_v19 = vpop.f32.mrb[3].mxu0  ;;  %v3518_v18 = vcombine.low %v1305_v13, %v1313_v14  ;;  %s4718_s19 = scalar_lea.vmem %s4690_s9, %s4231_s23 }
 0x1dc   : > { %v3520_v19 = vcombine.low %v1306_v15, %v1314_v17 }
 0x1df   : > { %1022 = vrot.lane.b32.xlu1 %v849_v16, %s4128_s27 }
 0x24d   : > { %v856_v20 = vpop.permute.xlu0 %855  ;;  %v945_v21 = vpop.permute.xlu1 %944 }
 0x24e   : > { %3887 = vmatpush3.xpose.msk.msra.mxu1 %vm857_vm6, %v856_v20  ;;  %v3521_v20 = vcombine.high %v1306_v15, %v1314_v17  ;;  %v3945_v17 = vld [vmem:[%s4279_s25 + $0xc0] sm:$0xff]  }
 0x24f   : > { %3891 = vmatprep.subr.mxu1 %v4124_v10 }
 0x251   : > { %3889 = vmatmul.mubr.msk.f32.vlgmr.msra.gmra.mrb[0].mxu1 %vm857_vm6, %v849_v16  ;;  %v1023_v30 = vpop.permute.xlu1 %1022 }
 0x252   : > { %3892 = vmatpush3.msra.mxu1 %v945_v21  ;;  %3893 = vmatprep.mubr.msk.f32.mxu1 %vm4125_vm4, %v4124_v10  ;;  %v1291_v21 = vld [vmem:[%s4264_s5 + $0x10] sm:$0xff] }
 0x253   : > { %3896 = vmatprep.subr.mxu1 %v4124_v10 }
 0x324   : > { %v928_v22 = vpop.f32.mrb[0].mxu1 }
 0x325   : > { %v3890_v23 = vpop.f32.mrb[1].mxu1  ;;  %v933_v24 = vsel %vm932_vm7, %v928_v22, -inf }
 0x326   : > { %934 = vmax.xlane.f32.xlu0 %v933_v24  ;;  %v1292_v23 = vld [vmem:[%s4264_s5 + $0x18] sm:$0xff]  ;;  %v4132_v24 = vmov 0  }
 0x3b3   : > { %v935_v25 = vpop.xlane.xlu0 %934 }
 0x3b4   : > { %v936_v26 = vsub.f32 %v928_v22, %v935_v25  ;;  %v1299_v22 = vld [vmem:[%s4264_s5 + $0x50] sm:$0xff] }
 0x3b5   : > { %v3507_v25 = vcombine.high %v1291_v21, %v1299_v22 }
 0x3b6   : > { %v937_v27 = vmul.f32 1.442695, %v936_v26  ;;  %v1300_v26 = vld [vmem:[%s4264_s5 + $0x58] sm:$0xff] }
 0x3b8   : > { %4072 = vpow2.f32 %v937_v27  ;;  %v3506_v27 = vcombine.low %v1291_v21, %v1299_v22  ;;  %v3949_v21 = vld [vmem:[%s4279_s25 + $0xc8] sm:$0xff]  }
 0x3b9   : > { %v3950_v22 = vld [vmem:[%s4279_s25 + $0x8] sm:$0xff]  }
 0x3c2   : > { %v4073_v28 = vpop.eup %4072 }
 0x3c3   : > { %v939_v29 = vsel %vm932_vm7, %v4073_v28, 0.0 }
 0x3c4   : > { %940 = vadd.xlane.f32.xlu1 %v939_v29  ;;  %v3509_v29 = vcombine.high %v1292_v23, %v1300_v26 }
 0x3d5   : > { %1020 = vrot.lane.b32.xlu1 %v849_v16, %s4129_s20 }
 0x451   : > { %v941_v31 = vpop.xlane.xlu1 %940 }
 0x452   : > { %4074 = vrcp.f32 %v941_v31 }
 0x455   : > { %v1021_v34 = vpop.permute.xlu1 %1020 }
 0x45c   : > { %v4075_v32 = vpop.eup %4074 }
 0x45d   : > { %v943_v33 = vmul.f32 %v4075_v32, %v4073_v28  ;;  %v3508_v28 = vcombine.low %v1292_v23, %v1300_v26  ;;  %v3951_v23 = vld [vmem:[%s4279_s25 + $0x88] sm:$0xff]   ;;  %v3954_v26 = vld [vmem:[%s4279_s25 + $0x10] sm:$0xff]  }
 0x45f   : > { %3894 = vmatmul.mubr.msk.f32.vlgmr.msra.gmra.mrb[2].mxu1 %vm932_vm7, %v943_v33 }
 0x460   : > { %3897 = vmatpush3.xpose.msk.msra.mxu1 %vm857_vm6, %v1023_v30  ;;  %3898 = vmatprep.mubr.msk.f32.mxu1 %vm4125_vm4, %v4124_v10 }
 0x461   : > { %3906 = vmatprep.subr.bf16.mxu1 %v4124_v10 }
 0x463   : > { %3899 = vmatmul.mubr.msk.f32.vlgmr.msra.gmra.mrb[4].mxu1 %vm857_vm6, %v1021_v34  ;;  %v3500_v34 = vld [vmem:[%s4717_s17] ss:$0 sm:$0xff] }
 0x464   : > { %3910 = vmatprep.mubr.msk.bf16.mxu1 %vm4125_vm4, %v4124_v10  ;;  %3907 = vmatpush3.bf16.msra.mxu1 %v3942_v49  ;;  %v1302_v49 = vld [vmem:[%s4264_s5 + $0x68] sm:$0xff] }
 0x465   : > { %3908 = vmatprep.subr.bf16.mxu1 %v4124_v10  ;;  %v3502_v10 = vcombine.low %v1289_v5, %v1297_v6  ;;  %v1311_v6 = vld [vmem:[%s4264_s5 + $0xb0] sm:$0xff] }
 0x468   : > { %3909 = vmatpush3.bf16.msra.mxu1 %v3943_v50 }
 0x532   : > { %v1016_v35 = vpop.f32.mrb[2].mxu1 }
 0x533   : > { %v3895_v36 = vpop.f32.mrb[3].mxu1 }
 0x534   : > { %v3501_v36 = vld [vmem:[%s4718_s19] ss:$0 sm:$0xff] }
 0x536   : > { %v1094_v37 = vpop.f32.mrb[4].mxu1 }
 0x537   : > { %v3900_v38 = vpop.f32.mrb[5].mxu1  ;;  %v1098_v39 = vsel %vm932_vm7, %v1094_v37, -inf }
 0x538   : > { %1099 = vmax.xlane.f32.xlu1 %v1098_v39  ;;  %v1307_v38 = vld [vmem:[%s4264_s5 + $0x90] sm:$0xff] }
 0x539   : > { %v1315_v39 = vld [vmem:[%s4264_s5 + $0xd0] sm:$0xff] }
 0x53a   : > { %v3522_v50 = vcombine.low %v1307_v38, %v1315_v39 }
 0x5c5   : > { %v1100_v40 = vpop.xlane.xlu1 %1099 }
 0x5c6   : > { %v1101_v41 = vsub.f32 %v1094_v37, %v1100_v40  ;;  %v1308_v40 = vld [vmem:[%s4264_s5 + $0x98] sm:$0xff] }
 0x5c8   : > { %v1102_v42 = vmul.f32 1.442695, %v1101_v41  ;;  %v1316_v41 = vld [vmem:[%s4264_s5 + $0xd8] sm:$0xff] }
 0x5ca   : > { %4076 = vpow2.f32 %v1102_v42 }
 0x5d4   : > { %v4077_v43 = vpop.eup %4076 }
 0x5d5   : > { %v1104_v44 = vsel %vm932_vm7, %v4077_v43, 0.0 }
 0x5d6   : > { %1105 = vadd.xlane.f32.xlu0 %v1104_v44  ;;  %v3523_v44 = vcombine.high %v1307_v38, %v1315_v39  ;;  %v3966_v38 = vld [vmem:[%s4279_s25 + $0x28] sm:$0xff]  }
 0x5d7   : > { %v3967_v39 = vld [vmem:[%s4279_s25 + $0xa8] sm:$0xff]  }
 0x5ec   : > { %1109 = vrot.lane.b32.xlu0 %v849_v16, %s4130_s16  ;;  %v3519_v16 = vcombine.high %v1305_v13, %v1313_v14  ;;  %s4133_s16 = smov [#allocation3]  }
 0x663   : > { %v1106_v45 = vpop.xlane.xlu0 %1105 }
 0x664   : > { %4078 = vrcp.f32 %v1106_v45  ;;  %v3525_v45 = vcombine.high %v1308_v40, %v1316_v41 }
 0x667   : > { %v1110_v46 = vpop.permute.xlu0 %1109 }
 0x668   : > { %3902 = vmatpush3.msra.mxu0 %v1110_v46  ;;  %v1293_v46 = vld [vmem:[%s4264_s5 + $0x20] sm:$0xff] }
 0x669   : > { %1568 = vmatprep.subr.bf16.mxu0 %v3503_v8  ;;  %v1312_v8 = vld [vmem:[%s4264_s5 + $0xb8] sm:$0xff] }
 0x66e   : > { %v4079_v47 = vpop.eup %4078 }
 0x66f   : > { %v1108_v48 = vmul.f32 %v4079_v47, %v4077_v43  ;;  %v1301_v47 = vld [vmem:[%s4264_s5 + $0x60] sm:$0xff] }
 0x671   : > { %3904 = vmatmul.mubr.msk.f32.vlgmr.msra.gmra.mrb[4].mxu0 %vm932_vm7, %v1108_v48  ;;  %v1294_v48 = vld [vmem:[%s4264_s5 + $0x28] sm:$0xff] }
 0x672   : > { %1569 = vmatpush1.bf16.msra.mxu0 %v3502_v10  ;;  %1600 = vmatprep.mubr.bf16.mxu0 %v4132_v24 }
 0x673   : > { %1570 = vmatprep.subr.bf16.mxu0 %v3519_v16  ;;  %v3944_v16 = vld [vmem:[%s4279_s25 + $0x40] sm:$0xff]  }
 0x676   : > { %1571 = vmatpush1.bf16.msra.mxu0 %v3518_v18  ;;  %v3946_v18 = vld [vmem:[%s4279_s25] sm:$0xff]  }
 0x677   : > { %1650 = vmatprep.subr.bf16.mxu0 %v3507_v25  ;;  %v3953_v25 = vld [vmem:[%s4279_s25 + $0xd0] sm:$0xff]  }
 0x744   : > { %v1181_v51 = vpop.f32.mrb[4].mxu0 }
 0x745   : > { %1186 = vrot.lane.b32.xlu0 %v1181_v51, %s4131_s26  ;;  %v3905_v52 = vpop.f32.mrb[5].mxu0  ;;  %v3524_v51 = vcombine.low %v1308_v40, %v1316_v41  ;;  %v3968_v40 = vld [vmem:[%s4279_s25 + $0x70] sm:$0xff]   ;;  %s3318_s26 = sshll.u32 %s4133_s16, 4  ;;  %s3319_s26 = int_to_ptr.vmem [resolvable:$true] %s3318_s26 }
 0x746   : > { %v3511_v52 = vcombine.high %v1293_v46, %v1301_v47  ;;  %v3969_v41 = vld [vmem:[%s4279_s25 + $0xf0] sm:$0xff]   ;;  %s4084_s28 = scalar_lea.vmem %s3319_s26, 128  ;;  %p4091_p9 = scmp.lt.s32.totalorder %s3319_s26, %s3319_s26 }
 0x747   : > { %p4085_p6 = scmp.ne.s32.totalorder %s3319_s26, %s4084_s28  ;;  %p4092_p10 = scmp.lt.s32.totalorder %s4084_s28, %s4084_s28 }
 0x749   : > { %p4086_p7 = pnand %p4085_p6, %p3918_p5  ;;  %p4093_p11 = por %p4092_p10, %p4091_p9 }
 0x74b   : > { %p4087_p8 = pneg %p4086_p7 }
 0x74d   : > { %p4094_p12 = pnand %p4093_p11, %p4087_p8 }
 0x7b7   : > { %v1187_v53 = vpop.permute.xlu0 %1186 }
 0x7b8   : > { %v1189_v54 = vsel %vm857_vm6, %v1016_v35, %v1187_v53  ;;  %v3513_v53 = vcombine.high %v1294_v48, %v1302_v49 }
 0x7b9   : > { %v1190_v55 = vpack.c.bf16 %v1189_v54, %v1189_v54  ;;  %v1309_v54 = vld [vmem:[%s4264_s5 + $0xa0] sm:$0xff] }
 0x7bb   : > { %3911 = vmatmul.mubr.msk.bf16.vlgmr.msra.gmra.mrb[8].mxu1 %vm810_vm5, %v1190_v55  ;;  %v1317_v55 = vld [vmem:[%s4264_s5 + $0xe0] sm:$0xff] }
 0x7bc   : > { %1641 = vmatprep.mubr.bf16.mxu1 %v4132_v24 }
 0x88e   : > { %v1251_v57 = vpop.f32.mrb[8].mxu1 }
 0x88f   : > { %v1252_v58 = vadd.f32 %v3496_v56, %v1251_v57  ;;  %v3912_v59 = vpop.f32.mrb[9].mxu1  ;;  %v1310_v56 = vld [vmem:[%s4264_s5 + $0xa8] sm:$0xff] }
 0x890   : > { %v1254_v60 = vpop.f32.mrb[10].mxu1  ;;  %v1318_v57 = vld [vmem:[%s4264_s5 + $0xe8] sm:$0xff]  ;;  %v3512_v59 = vcombine.low %v1294_v48, %v1302_v49  ;;  %v3975_v48 = vld [vmem:[%s4279_s25 + $0xb8] sm:$0xff]   ;;  %v3976_v49 = vld [vmem:[%s4279_s25 + $0x140] sm:$0xff]  }
 0x891   : > { %v3913_v61 = vpop.f32.mrb[11].mxu1  ;;  %v1257_v62 = vadd.f32 %v1252_v58, %v4308_v12  ;;  %v3505_v12 = vcombine.high %v1290_v7, %v1298_v9  ;;  %v3510_v58 = vcombine.low %v1293_v46, %v1301_v47  ;;  %v3527_v60 = vcombine.high %v1309_v54, %v1317_v55  ;;  %v1319_v7 = vld [vmem:[%s4264_s5 + $0xf0] sm:$0xff]  ;;  %v1320_v9 = vld [vmem:[%s4264_s5 + $0xf8] sm:$0xff] }
 0x892   : > { %v3529_v61 = vcombine.high %v1310_v56, %v1318_v57  ;;  %v3533_v13 = vcombine.high %v1312_v8, %v1320_v9  ;;  %v3530_v14 = vcombine.low %v1311_v6, %v1319_v7  ;;  %v3532_v15 = vcombine.low %v1312_v8, %v1320_v9  ;;  %v3973_v46 = vld [vmem:[%s4279_s25 + $0xf8] sm:$0xff]  }
 0x893   : > { %v1260_v63 = vsel %vm810_vm5, %v1257_v62, 0.0  ;;  %1609 = vmatprep.subr.bf16.mxu1 %v3505_v12  ;;  %v3531_v12 = vcombine.high %v1311_v6, %v1319_v7  ;;  %v3974_v47 = vld [vmem:[%s4279_s25 + $0x38] sm:$0xff]  }
 0x894   : > { %1261 = vadd.xlane.f32.xlu0 %v1260_v63  ;;  %1610 = vmatpush1.bf16.msra.mxu1 %v3504_v11  ;;  %v1303_v63 = vld [vmem:[%s4264_s5 + $0x70] sm:$0xff] }
 0x895   : > { %1611 = vmatprep.subr.bf16.mxu1 %v3521_v20  ;;  %v3948_v20 = vld [vmem:[%s4279_s25 + $0x48] sm:$0xff]  }
 0x898   : > { %1612 = vmatpush1.bf16.msra.mxu1 %v3520_v19  ;;  %v3947_v19 = vld [vmem:[%s4279_s25 + $0x80] sm:$0xff]  }
 0x899   : > { %1691 = vmatprep.subr.bf16.mxu1 %v3509_v29  ;;  %v3957_v29 = vld [vmem:[%s4279_s25 + $0xd8] sm:$0xff]  }
 0x921   : > { %v1262_v0 = vpop.xlane.xlu0 %1261 }
 0x922   : > { %v1264_v1 = vmul.f32 0.03125, %v1262_v0  ;;  %v1296_v0 = vld [vmem:[%s4264_s5 + $0x38] sm:$0xff] }
 0x924   : > { %v1265_v2 = vsub.f32 %v1257_v62, %v1264_v1  ;;  %v1295_v62 = vld [vmem:[%s4264_s5 + $0x30] sm:$0xff]  ;;  %v1304_v1 = vld [vmem:[%s4264_s5 + $0x78] sm:$0xff] }
 0x925   : > { %v3517_v5 = vcombine.high %v1296_v0, %v1304_v1  ;;  %v3514_v10 = vcombine.low %v1295_v62, %v1303_v63  ;;  %v3516_v11 = vcombine.low %v1296_v0, %v1304_v1 }
 0x926   : > { %v1266_v3 = vmul.f32 %v1265_v2, %v1265_v2 }
 0x928   : > { %v1267_v4 = vsel %vm810_vm5, %v1266_v3, 0.0  ;;  %v3528_v3 = vcombine.low %v1310_v56, %v1318_v57 }
 0x929   : > { %1268 = vadd.xlane.f32.xlu1 %v1267_v4  ;;  %v3515_v4 = vcombine.high %v1295_v62, %v1303_v63 }
 0x9b6   : > { %v1269_v30 = vpop.xlane.xlu1 %1268 }
 0x9b7   : > { %v1270_v31 = vmul.f32 0.03125, %v1269_v30  ;;  %v3958_v30 = vld [vmem:[%s4279_s25 + $0x18] sm:$0xff]  }
 0x9b9   : > { %v1271_v32 = vadd.f32 1e-05, %v1270_v31  ;;  %v3959_v31 = vld [vmem:[%s4279_s25 + $0x98] sm:$0xff]  }
 0x9bb   : > { %4080 = vrsqrt.f32 %v1271_v32  ;;  %v3960_v32 = vld [vmem:[%s4279_s25 + $0x60] sm:$0xff]  }
 0x9c5   : > { %v4081_v33 = vpop.eup %4080 }
 0x9c6   : > { %v1273_v35 = vmul.f32 %v4081_v33, %v1265_v2  ;;  %v3526_v2 = vcombine.low %v1309_v54, %v1317_v55  ;;  %v3961_v33 = vld [vmem:[%s4279_s25 + $0xe0] sm:$0xff]   ;;  %v4466_v54 = vld [vmem:[%s4269_s6 + $0x8] sm:$0xff] }
 0x9c8   : > { %v1280_v37 = vmul.f32 %v3500_v34, %v1273_v35  ;;  %v3962_v34 = vld [vmem:[%s4279_s25 + $0x20] sm:$0xff]  }
 0x9c9   : > { %v3963_v35 = vld [vmem:[%s4279_s25 + $0xa0] sm:$0xff]  }
 0x9ca   : > { %v4384_v42 = vadd.f32 %v3501_v36, %v1280_v37  ;;  %v3964_v36 = vld [vmem:[%s4279_s25 + $0x68] sm:$0xff]  }
 0x9cb   : > { %v3965_v37 = vld [vmem:[%s4279_s25 + $0xe8] sm:$0xff]  }
 0x9cc   : > { %v4388_v43 = vpack.c.bf16 %v4384_v42, %v4384_v42 }
 0x9ce   : > { %3534 = vmatmul.mubr.msk.bf16.vlgmr.msra.gmra.mrb[8].mxu0 %vm810_vm5, %v4388_v43  ;;  %3535 = vmatmul.mubr.msk.bf16.vlgmr.msra.gmra.mrb[12].mxu1 %vm810_vm5, %v4388_v43 }
 0x9cf   : > { %1651 = vmatpush1.bf16.msra.mxu0 %v3506_v27  ;;  %1692 = vmatpush1.bf16.msra.mxu1 %v3508_v28  ;;  %v3955_v27 = vld [vmem:[%s4279_s25 + $0x90] sm:$0xff]   ;;  %v3956_v28 = vld [vmem:[%s4279_s25 + $0x58] sm:$0xff]  }
 0x9d0   : > { %1652 = vmatprep.subr.bf16.mxu0 %v3523_v44  ;;  %1693 = vmatprep.subr.bf16.mxu1 %v3525_v45  ;;  %v3971_v44 = vld [vmem:[%s4279_s25 + $0xb0] sm:$0xff]   ;;  %v3972_v45 = vld [vmem:[%s4279_s25 + $0x78] sm:$0xff]  }
 0x9d1   : > { %1682 = vmatprep.mubr.bf16.mxu0 %v4132_v24  ;;  %1723 = vmatprep.mubr.bf16.mxu1 %v4132_v24 }
 0x9d3   : > { %1653 = vmatpush1.bf16.msra.mxu0 %v3522_v50  ;;  %1694 = vmatpush1.bf16.msra.mxu1 %v3524_v51  ;;  %v3977_v50 = vld [vmem:[%s4279_s25 + $0x1c0] sm:$0xff]   ;;  %v1325_v51 = vlaneseq }
 0x9d4   : > { %1732 = vmatprep.subr.bf16.mxu0 %v3511_v52  ;;  %1773 = vmatprep.subr.bf16.mxu1 %v3513_v53 }
 0x9d5   : > { %v4462_v52 = vshrl.u32 %v1325_v51, 7  ;;  %v3987_v51 = vld [vmem:[%s4279_s25 + $0x190] sm:$0xff]  }
 0x9d6   : > { %3536 = vmatmul.mubr.msk.bf16.vlgmr.msra.gmra.mrb[12].mxu0 %vm810_vm5, %v4388_v43  ;;  %3537 = vmatmul.mubr.msk.bf16.vlgmr.msra.gmra.mrb[16].mxu1 %vm810_vm5, %v4388_v43 }
 0x9d7   : > { %1733 = vmatpush1.bf16.msra.mxu0 %v3510_v58  ;;  %1774 = vmatpush1.bf16.msra.mxu1 %v3512_v59  ;;  %v1351_v53 = vsub.s32 6, %v4462_v52  ;;  %v1327_v56 = vsub.s32 0, %v4462_v52  ;;  %v1335_v57 = vsub.s32 2, %v4462_v52  ;;  %v4476_v58 = vld [vmem:[%s4269_s6] sm:$0xff]  ;;  %v1331_v59 = vsub.s32 1, %v4462_v52 }
 0x9d8   : > { %1734 = vmatprep.subr.bf16.mxu0 %v3527_v60  ;;  %1775 = vmatprep.subr.bf16.mxu1 %v3529_v61  ;;  %v1339_v60 = vsub.s32 3, %v4462_v52 }
 0x9d9   : > { %1764 = vmatprep.mubr.bf16.mxu0 %v4132_v24  ;;  %1805 = vmatprep.mubr.bf16.mxu1 %v4132_v24  ;;  %v4471_v55 = vrot.slane %v4466_v54, %v1351_v53  ;;  %v1328_v61 = vrot.slane %v4476_v58, %v1327_v56  ;;  %v1336_v62 = vrot.slane %v4476_v58, %v1335_v57 }
 0x9da   : > { %v1332_v63 = vrot.slane %v4476_v58, %v1331_v59  ;;  %v1340_v0 = vrot.slane %v4476_v58, %v1339_v60 }
 0x9db   : > { %1735 = vmatpush1.bf16.msra.mxu0 %v3526_v2  ;;  %1776 = vmatpush1.bf16.msra.mxu1 %v3528_v3 }
 0x9dc   : > { %1814 = vmatprep.subr.bf16.mxu0 %v3515_v4  ;;  %1855 = vmatprep.subr.bf16.mxu1 %v3517_v5 }
 0x9de   : > { %3538 = vmatmul.mubr.msk.bf16.vlgmr.msra.gmra.mrb[16].mxu0 %vm810_vm5, %v4388_v43  ;;  %3539 = vmatmul.mubr.msk.bf16.vlgmr.msra.gmra.mrb[20].mxu1 %vm810_vm5, %v4388_v43 }
 0x9df   : > { %1815 = vmatpush1.bf16.msra.mxu0 %v3514_v10  ;;  %1856 = vmatpush1.bf16.msra.mxu1 %v3516_v11  ;;  %v1347_v11 = vsub.s32 5, %v4462_v52 }
 0x9e0   : > { %1816 = vmatprep.subr.bf16.mxu0 %v3531_v12  ;;  %1857 = vmatprep.subr.bf16.mxu1 %v3533_v13  ;;  %v1355_v12 = vsub.s32 7, %v4462_v52 }
 0x9e1   : > { %1846 = vmatprep.mubr.bf16.mxu0 %v4132_v24  ;;  %1887 = vmatprep.mubr.bf16.mxu1 %v4132_v24  ;;  %v3952_v24 = vld [vmem:[%s4279_s25 + $0x50] sm:$0xff]  }
 0x9e3   : > { %1817 = vmatpush1.bf16.msra.mxu0 %v3530_v14  ;;  %1858 = vmatpush1.bf16.msra.mxu1 %v3532_v15 }
 0x9e4   : > { %3697 = vmatprep.subr.bf16.mxu0 %v3944_v16  ;;  %3719 = vmatprep.subr.bf16.mxu1 %v3945_v17 }
 0x9e6   : > { %3540 = vmatmul.mubr.msk.bf16.vlgmr.msra.gmra.mrb[20].mxu0 %vm810_vm5, %v4388_v43  ;;  %3541 = vmatmul.mubr.msk.bf16.vlgmr.msra.gmra.mrb[24].mxu1 %vm810_vm5, %v4388_v43  ;;  %v3970_v43 = vld [vmem:[%s4279_s25 + $0x30] sm:$0xff]  }
 0x9e7   : > { %3698 = vmatpush3.bf16.msra.mxu0 %v3946_v18  ;;  %3720 = vmatpush3.bf16.msra.mxu1 %v3947_v19 }
 0x9e8   : > { %3699 = vmatprep.subr.bf16.mxu0 %v3948_v20  ;;  %3721 = vmatprep.subr.bf16.mxu1 %v3949_v21  ;;  %v1348_v21 = vrot.slane %v4476_v58, %v1347_v11 }
 0x9eb   : > { %3700 = vmatpush3.bf16.msra.mxu0 %v3950_v22  ;;  %3722 = vmatpush3.bf16.msra.mxu1 %v3951_v23  ;;  %v1356_v22 = vrot.slane %v4476_v58, %v1355_v12  ;;  %v3978_v23 = vld [vmem:[%s4279_s25 + $0x100] sm:$0xff]  }
 0x9ec   : > { %3701 = vmatprep.subr.bf16.mxu0 %v3952_v24  ;;  %3723 = vmatprep.subr.bf16.mxu1 %v3953_v25  ;;  %v3979_v24 = vld [vmem:[%s4279_s25 + $0x180] sm:$0xff]  }
 0x9ef   : > { %3702 = vmatpush3.bf16.msra.mxu0 %v3954_v26  ;;  %3724 = vmatpush3.bf16.msra.mxu1 %v3955_v27  ;;  %v3980_v27 = vld [vmem:[%s4279_s25 + $0x148] sm:$0xff]  }
 0x9f0   : > { %3703 = vmatprep.subr.bf16.mxu0 %v3956_v28  ;;  %3725 = vmatprep.subr.bf16.mxu1 %v3957_v29  ;;  %v3981_v28 = vld [vmem:[%s4279_s25 + $0x1c8] sm:$0xff]  }
 0x9f3   : > { %3704 = vmatpush3.bf16.msra.mxu0 %v3958_v30  ;;  %3726 = vmatpush3.bf16.msra.mxu1 %v3959_v31 }
 0x9f4   : > { %3705 = vmatprep.subr.bf16.mxu0 %v3960_v32  ;;  %3727 = vmatprep.subr.bf16.mxu1 %v3961_v33 }
 0x9f7   : > { %3706 = vmatpush3.bf16.msra.mxu0 %v3962_v34  ;;  %3728 = vmatpush3.bf16.msra.mxu1 %v3963_v35 }
 0x9f8   : > { %3707 = vmatprep.subr.bf16.mxu0 %v3964_v36  ;;  %3729 = vmatprep.subr.bf16.mxu1 %v3965_v37  ;;  %v3982_v37 = vld [vmem:[%s4279_s25 + $0x108] sm:$0xff]  }
 0x9fb   : > { %3708 = vmatpush3.bf16.msra.mxu0 %v3966_v38  ;;  %3730 = vmatpush3.bf16.msra.mxu1 %v3967_v39  ;;  %v3983_v38 = vld [vmem:[%s4279_s25 + $0x188] sm:$0xff]  }
 0x9fc   : > { %3709 = vmatprep.subr.bf16.mxu0 %v3968_v40  ;;  %3731 = vmatprep.subr.bf16.mxu1 %v3969_v41  ;;  %v3984_v41 = vld [vmem:[%s4279_s25 + $0x150] sm:$0xff]  }
 0x9ff   : > { %3710 = vmatpush3.bf16.msra.mxu0 %v3970_v43  ;;  %3732 = vmatpush3.bf16.msra.mxu1 %v3971_v44  ;;  %v3985_v43 = vld [vmem:[%s4279_s25 + $0x1d0] sm:$0xff]  }
 0xa00   : > { %3711 = vmatprep.subr.bf16.mxu0 %v3972_v45  ;;  %3733 = vmatprep.subr.bf16.mxu1 %v3973_v46  ;;  %v1360_v46 = vrot.slane %v4466_v54, %v1327_v56 }
 0xa03   : > { %3712 = vmatpush3.bf16.msra.mxu0 %v3974_v47  ;;  %3734 = vmatpush3.bf16.msra.mxu1 %v3975_v48  ;;  %v1368_v47 = vrot.slane %v4466_v54, %v1335_v57 }
 0xa04   : > { %3741 = vmatprep.subr.bf16.mxu0 %v3976_v49  ;;  %3763 = vmatprep.subr.bf16.mxu1 %v3977_v50  ;;  %v3986_v50 = vld [vmem:[%s4279_s25 + $0x110] sm:$0xff]  }
 0xaa1   : > { %v1602_v1 = vpop.f32.mrb[8].mxu0  ;;  %v1643_v2 = vpop.f32.mrb[12].mxu1 }
 0xaa2   : > { %v1603_v3 = vadd.f32 %v1602_v1, %v1328_v61  ;;  %v1644_v4 = vadd.f32 %v1643_v2, %v1336_v62  ;;  %v1604_v5 = vpop.f32.mrb[9].mxu0  ;;  %v1645_v6 = vpop.f32.mrb[13].mxu1  ;;  %v3988_v61 = vld [vmem:[%s4279_s25 + $0x158] sm:$0xff]  }
 0xaa3   : > { %v1605_v7 = vadd.f32 %v1604_v5, %v1332_v63  ;;  %v1646_v8 = vadd.f32 %v1645_v6, %v1340_v0  ;;  %v1606_v9 = vpop.f32.mrb[10].mxu0  ;;  %v1647_v10 = vpop.f32.mrb[14].mxu1  ;;  %v3989_v62 = vld [vmem:[%s4279_s25 + $0x1d8] sm:$0xff]  }
 0xaa4   : > { %v1896_v13 = vmax.f32 %v1603_v3, 0.0  ;;  %v1898_v14 = vmax.f32 %v1644_v4, 0.0  ;;  %v1607_v15 = vpop.f32.mrb[11].mxu0  ;;  %v1648_v16 = vpop.f32.mrb[15].mxu1  ;;  %v3990_v5 = vld [vmem:[%s4279_s25 + $0x118] sm:$0xff]   ;;  %v3992_v10 = vld [vmem:[%s4279_s25 + $0x160] sm:$0xff]  }
 0xaa5   : > { %v1897_v17 = vmax.f32 %v1605_v7, 0.0  ;;  %v1899_v18 = vmax.f32 %v1646_v8, 0.0  ;;  %v3991_v6 = vld [vmem:[%s4279_s25 + $0x198] sm:$0xff]   ;;  %v1343_v7 = vsub.s32 4, %v4462_v52  ;;  %v3994_v15 = vld [vmem:[%s4279_s25 + $0x120] sm:$0xff]  }
 0xaa6   : > { %v1912_v25 = vpack.c.bf16 %v1896_v13, %v1896_v13  ;;  %v1914_v26 = vpack.c.bf16 %v1898_v14, %v1898_v14  ;;  %v3993_v13 = vld [vmem:[%s4279_s25 + $0x1e0] sm:$0xff]   ;;  %v4038_v52 = vld [vmem:[%s4279_s25 + $0x238] sm:$0xff]  }
 0xaa7   : > { %v1913_v19 = vpack.c.bf16 %v1897_v17, %v1897_v17  ;;  %v1915_v20 = vpack.c.bf16 %v1899_v18, %v1899_v18  ;;  %v1376_v14 = vrot.slane %v4466_v54, %v1343_v7  ;;  %v3995_v16 = vld [vmem:[%s4279_s25 + $0x1a0] sm:$0xff]   ;;  %v3996_v17 = vld [vmem:[%s4279_s25 + $0x168] sm:$0xff]  }
 0xaa8   : > { %v3997_v18 = vld [vmem:[%s4279_s25 + $0x1e8] sm:$0xff]  }
 0xaa9   : > { %v4500_v29 = vpop.f32.mrb[12].mxu0  ;;  %v4502_v30 = vpop.f32.mrb[16].mxu1  ;;  %2991 = vmatprep.mubr.bf16.mxu0 %v1913_v19  ;;  %3031 = vmatprep.mubr.bf16.mxu1 %v1915_v20 }
 0xaaa   : > { %v1686_v31 = vpop.f32.mrb[13].mxu0  ;;  %v1727_v32 = vpop.f32.mrb[17].mxu1  ;;  %2992 = vmatmul.mubr.bf16.vlgmr.msra.gmra.mrb[24].mxu0 %v1912_v25  ;;  %3032 = vmatmul.mubr.bf16.vlgmr.msra.gmra.mrb[28].mxu1 %v1914_v26 }
 0xaab   : > { %v1687_v33 = vadd.f32 %v1686_v31, %v1348_v21  ;;  %v1728_v34 = vadd.f32 %v1727_v32, %v1356_v22  ;;  %3742 = vmatpush3.bf16.msra.mxu0 %v3978_v23  ;;  %3764 = vmatpush3.bf16.msra.mxu1 %v3979_v24  ;;  %v1688_v35 = vpop.f32.mrb[14].mxu0  ;;  %v1729_v36 = vpop.f32.mrb[18].mxu1  ;;  %v1344_v31 = vrot.slane %v4476_v58, %v1343_v7  ;;  %v4019_v7 = vld [vmem:[%s4279_s25 + $0x290] sm:$0xff]  }
 0xaac   : > { %v1689_v39 = vpop.f32.mrb[15].mxu0  ;;  %v1730_v40 = vpop.f32.mrb[19].mxu1  ;;  %3743 = vmatprep.subr.bf16.mxu0 %v3980_v27  ;;  %3765 = vmatprep.subr.bf16.mxu1 %v3981_v28  ;;  %v3998_v27 = vld [vmem:[%s4279_s25 + $0x128] sm:$0xff]   ;;  %v4001_v35 = vld [vmem:[%s4279_s25 + $0x1f0] sm:$0xff]   ;;  %v1364_v36 = vrot.slane %v4466_v54, %v1331_v59  ;;  %v4005_v59 = vld [vmem:[%s4279_s25 + $0x1f8] sm:$0xff]  }
 0xaad   : > { %v1901_v44 = vmax.f32 %v1687_v33, 0.0  ;;  %v1903_v45 = vmax.f32 %v1728_v34, 0.0  ;;  %v3999_v28 = vld [vmem:[%s4279_s25 + $0x1a8] sm:$0xff]   ;;  %v4000_v34 = vld [vmem:[%s4279_s25 + $0x170] sm:$0xff]   ;;  %v4004_v40 = vld [vmem:[%s4279_s25 + $0x178] sm:$0xff]  }
 0xaaf   : > { %v1917_v48 = vpack.c.bf16 %v1901_v44, %v1901_v44  ;;  %v1919_v49 = vpack.c.bf16 %v1903_v45, %v1903_v45  ;;  %3744 = vmatpush3.bf16.msra.mxu0 %v3982_v37  ;;  %3766 = vmatpush3.bf16.msra.mxu1 %v3983_v38  ;;  %v1372_v37 = vrot.slane %v4466_v54, %v1339_v60  ;;  %v4006_v60 = vld [vmem:[%s4279_s25 + $0x138] sm:$0xff]  }
 0xab0   : > { %3745 = vmatprep.subr.bf16.mxu0 %v3984_v41  ;;  %3767 = vmatprep.subr.bf16.mxu1 %v3985_v43  ;;  %v1685_v38 = vadd.f32 %v4500_v29, %v1344_v31  ;;  %v4007_v44 = vld [vmem:[%s4279_s25 + $0x1b8] sm:$0xff]   ;;  %v4008_v29 = vld [vmem:[%s4279_s25 + $0x240] sm:$0xff]   ;;  %v1388_v31 = vrot.slane %v4466_v54, %v1355_v12 }
 0xab1   : > { %v1766_v63 = vpop.f32.mrb[16].mxu0  ;;  %v1807_v0 = vpop.f32.mrb[20].mxu1  ;;  %3071 = vmatprep.mubr.bf16.mxu0 %v1917_v48  ;;  %3111 = vmatprep.mubr.bf16.mxu1 %v1919_v49  ;;  %v4010_v49 = vld [vmem:[%s4279_s25 + $0x200] sm:$0xff]   ;;  %v4039_v12 = vld [vmem:[%s4279_s25 + $0x2b8] sm:$0xff]  }
 0xab2   : > { %v4514_v56 = vadd.f32 %v1766_v63, %v1360_v46  ;;  %v4516_v57 = vadd.f32 %v1807_v0, %v1368_v47  ;;  %v1768_v1 = vpop.f32.mrb[17].mxu0  ;;  %v1809_v2 = vpop.f32.mrb[21].mxu1  ;;  %v1900_v45 = vmax.f32 %v1685_v38, 0.0  ;;  %v4012_v63 = vld [vmem:[%s4279_s25 + $0x248] sm:$0xff]  }
 0xab3   : > { %3746 = vmatpush3.bf16.msra.mxu0 %v3986_v50  ;;  %3768 = vmatpush3.bf16.msra.mxu1 %v3987_v51  ;;  %v1770_v3 = vpop.f32.mrb[18].mxu0  ;;  %v1811_v4 = vpop.f32.mrb[22].mxu1  ;;  %v1769_v41 = vadd.f32 %v1768_v1, %v1364_v36  ;;  %v1810_v43 = vadd.f32 %v1809_v2, %v1372_v37  ;;  %v4013_v0 = vld [vmem:[%s4279_s25 + $0x2c8] sm:$0xff]   ;;  %v4040_v36 = vld [vmem:[%s4279_s25 + $0x340] sm:$0xff]  }
 0xab4   : > { %v1771_v8 = vpop.f32.mrb[19].mxu0  ;;  %v1812_v9 = vpop.f32.mrb[23].mxu1  ;;  %3747 = vmatprep.subr.bf16.mxu0 %v3988_v61  ;;  %3769 = vmatprep.subr.bf16.mxu1 %v3989_v62  ;;  %v1916_v50 = vpack.c.bf16 %v1900_v45, %v1900_v45  ;;  %v4011_v61 = vld [vmem:[%s4279_s25 + $0x280] sm:$0xff]   ;;  %v4014_v2 = vld [vmem:[%s4279_s25 + $0x208] sm:$0xff]   ;;  %v4016_v4 = vld [vmem:[%s4279_s25 + $0x250] sm:$0xff]   ;;  %v1906_v37 = vmax.f32 %v4516_v57, 0.0 }
 0xab5   : > { %v1905_v47 = vmax.f32 %v1769_v41, 0.0  ;;  %v1907_v48 = vmax.f32 %v1810_v43, 0.0  ;;  %v4015_v3 = vld [vmem:[%s4279_s25 + $0x288] sm:$0xff]   ;;  %v4020_v8 = vld [vmem:[%s4279_s25 + $0x258] sm:$0xff]   ;;  %v4049_v45 = vld [vmem:[%s4279_s25 + $0x3d0] sm:$0xff]  }
 0xab6   : > { %v4021_v9 = vld [vmem:[%s4279_s25 + $0x2d8] sm:$0xff]   ;;  %v4045_v57 = vld [vmem:[%s4279_s25 + $0x3c8] sm:$0xff]  }
 0xab7   : > { %3748 = vmatpush3.bf16.msra.mxu0 %v3990_v5  ;;  %3770 = vmatpush3.bf16.msra.mxu1 %v3991_v6  ;;  %v1921_v62 = vpack.c.bf16 %v1905_v47, %v1905_v47  ;;  %v1923_v1 = vpack.c.bf16 %v1907_v48, %v1907_v48  ;;  %v4017_v5 = vld [vmem:[%s4279_s25 + $0x2d0] sm:$0xff]   ;;  %v4046_v43 = vld [vmem:[%s4279_s25 + $0x308] sm:$0xff]   ;;  %v4053_v47 = vld [vmem:[%s4279_s25 + $0x3d8] sm:$0xff]  }
 0xab8   : > { %3749 = vmatprep.subr.bf16.mxu0 %v3992_v10  ;;  %3771 = vmatprep.subr.bf16.mxu1 %v3993_v13  ;;  %v4018_v6 = vld [vmem:[%s4279_s25 + $0x210] sm:$0xff]   ;;  %v4022_v10 = vld [vmem:[%s4279_s25 + $0x218] sm:$0xff]  }
 0xab9   : > { %v1848_v19 = vpop.f32.mrb[20].mxu0  ;;  %v1889_v20 = vpop.f32.mrb[24].mxu1  ;;  %v4023_v13 = vld [vmem:[%s4279_s25 + $0x298] sm:$0xff]  }
 0xaba   : > { %v4528_v21 = vadd.f32 %v1848_v19, %v1376_v14  ;;  %v4531_v22 = vadd.f32 %v1889_v20, %v4471_v55  ;;  %v4533_v23 = vpop.f32.mrb[21].mxu0  ;;  %v4535_v24 = vpop.f32.mrb[25].mxu1  ;;  %v1352_v55 = vrot.slane %v4476_v58, %v1351_v53  ;;  %v4002_v53 = vld [vmem:[%s4279_s25 + $0x130] sm:$0xff]   ;;  %v4024_v14 = vld [vmem:[%s4279_s25 + $0x260] sm:$0xff]   ;;  %v4029_v19 = vld [vmem:[%s4279_s25 + $0x2e8] sm:$0xff]  }
 0xabb   : > { %3750 = vmatpush3.bf16.msra.mxu0 %v3994_v15  ;;  %3772 = vmatpush3.bf16.msra.mxu1 %v3995_v16  ;;  %v1852_v25 = vpop.f32.mrb[22].mxu0  ;;  %v1893_v26 = vpop.f32.mrb[26].mxu1  ;;  %v4003_v58 = vld [vmem:[%s4279_s25 + $0x1b0] sm:$0xff]   ;;  %v4025_v15 = vld [vmem:[%s4279_s25 + $0x2e0] sm:$0xff]   ;;  %v4030_v20 = vld [vmem:[%s4279_s25 + $0x228] sm:$0xff]  }
 0xabc   : > { %v1853_v32 = vpop.f32.mrb[23].mxu0  ;;  %v1894_v33 = vpop.f32.mrb[27].mxu1  ;;  %3751 = vmatprep.subr.bf16.mxu0 %v3996_v17  ;;  %3773 = vmatprep.subr.bf16.mxu1 %v3997_v18  ;;  %v1726_v39 = vadd.f32 %v4502_v30, %v1352_v55  ;;  %v4009_v30 = vld [vmem:[%s4279_s25 + $0x2c0] sm:$0xff]   ;;  %v4028_v18 = vld [vmem:[%s4279_s25 + $0x268] sm:$0xff]   ;;  %v4032_v26 = vld [vmem:[%s4279_s25 + $0x270] sm:$0xff]  }
 0xabd   : > { %v4026_v16 = vld [vmem:[%s4279_s25 + $0x220] sm:$0xff]   ;;  %v4031_v25 = vld [vmem:[%s4279_s25 + $0x2a8] sm:$0xff]   ;;  %v4034_v55 = vld [vmem:[%s4279_s25 + $0x230] sm:$0xff]  }
 0xabe   : > { %v1902_v46 = vmax.f32 %v1726_v39, 0.0  ;;  %v4027_v17 = vld [vmem:[%s4279_s25 + $0x2a0] sm:$0xff]   ;;  %v4035_v32 = vld [vmem:[%s4279_s25 + $0x2b0] sm:$0xff]   ;;  %v4036_v33 = vld [vmem:[%s4279_s25 + $0x278] sm:$0xff]   ;;  %v1922_v39 = vpack.c.bf16 %v1906_v37, %v1906_v37 }
 0xabf   : > { %3752 = vmatpush3.bf16.msra.mxu0 %v3998_v27  ;;  %3774 = vmatpush3.bf16.msra.mxu1 %v3999_v28  ;;  %v4033_v27 = vld [vmem:[%s4279_s25 + $0x2f0] sm:$0xff]   ;;  %v1380_v28 = vrot.slane %v4466_v54, %v1347_v11  ;;  %v1892_v11 = vadd.f32 %v4535_v24, %v1388_v31  ;;  %v1904_v54 = vmax.f32 %v4514_v56, 0.0  ;;  %v4043_v56 = vld [vmem:[%s4279_s25 + $0x380] sm:$0xff]   ;;  %v4054_v48 = vld [vmem:[%s4279_s25 + $0x318] sm:$0xff]  }
 0xac0   : > { %3753 = vmatprep.subr.bf16.mxu0 %v4000_v34  ;;  %3775 = vmatprep.subr.bf16.mxu1 %v4001_v35  ;;  %v1918_v51 = vpack.c.bf16 %v1902_v46, %v1902_v46  ;;  %v4037_v34 = vld [vmem:[%s4279_s25 + $0x2f8] sm:$0xff]   ;;  %v4050_v46 = vld [vmem:[%s4279_s25 + $0x310] sm:$0xff]  }
 0xac1   : > { %v1851_v35 = vadd.f32 %v4533_v23, %v1380_v28  ;;  %v1911_v38 = vmax.f32 %v1892_v11, 0.0  ;;  %v4042_v23 = vld [vmem:[%s4279_s25 + $0x300] sm:$0xff]   ;;  %v1920_v24 = vpack.c.bf16 %v1904_v54, %v1904_v54 }
 0xac3   : > { %3754 = vmatpush3.bf16.msra.mxu0 %v4002_v53  ;;  %3776 = vmatpush3.bf16.msra.mxu1 %v4003_v58  ;;  %v4041_v53 = vld [vmem:[%s4279_s25 + $0x3c0] sm:$0xff]   ;;  %v1909_v58 = vmax.f32 %v1851_v35, 0.0  ;;  %v1927_v41 = vpack.c.bf16 %v1911_v38, %v1911_v38 }
 0xac4   : > { %3755 = vmatprep.subr.bf16.mxu0 %v4004_v40  ;;  %3777 = vmatprep.subr.bf16.mxu1 %v4005_v59  ;;  %v4044_v40 = vld [vmem:[%s4279_s25 + $0x348] sm:$0xff]  }
 0xac5   : > { %v1925_v59 = vpack.c.bf16 %v1909_v58, %v1909_v58 }
 0xac7   : > { %3756 = vmatpush3.bf16.msra.mxu0 %v4006_v60  ;;  %3778 = vmatpush3.bf16.msra.mxu1 %v4007_v44  ;;  %v4047_v60 = vld [vmem:[%s4279_s25 + $0x388] sm:$0xff]   ;;  %v4048_v44 = vld [vmem:[%s4279_s25 + $0x350] sm:$0xff]  }
 0xac8   : > { %3785 = vmatprep.subr.bf16.mxu0 %v4008_v29  ;;  %3807 = vmatprep.subr.bf16.mxu1 %v4009_v30  ;;  %v4051_v29 = vld [vmem:[%s4279_s25 + $0x390] sm:$0xff]   ;;  %v4052_v30 = vld [vmem:[%s4279_s25 + $0x358] sm:$0xff]  }
 0xaca   : > { %3072 = vmatmul.mubr.bf16.vlgmr.msra.gmra.mrb[28].mxu0 %v1916_v50  ;;  %3112 = vmatmul.mubr.bf16.vlgmr.msra.gmra.mrb[32].mxu1 %v1918_v51  ;;  %v4056_v50 = vld [vmem:[%s4279_s25 + $0x360] sm:$0xff]  }
 0xacb   : > { %3786 = vmatpush3.bf16.msra.mxu0 %v4010_v49  ;;  %3151 = vmatprep.mubr.bf16.mxu0 %v1921_v62  ;;  %v4055_v49 = vld [vmem:[%s4279_s25 + $0x398] sm:$0xff]   ;;  %v4057_v51 = vld [vmem:[%s4279_s25 + $0x3e0] sm:$0xff]  }
 0xacc   : > { %3808 = vmatpush3.bf16.msra.mxu1 %v4011_v61  ;;  %3191 = vmatprep.mubr.bf16.mxu1 %v1923_v1  ;;  %v4058_v61 = vld [vmem:[%s4279_s25 + $0x320] sm:$0xff]   ;;  %v4062_v1 = vld [vmem:[%s4279_s25 + $0x328] sm:$0xff]  }
 0xacd   : > { %3787 = vmatprep.subr.bf16.mxu0 %v4012_v63  ;;  %3809 = vmatprep.subr.bf16.mxu1 %v4013_v0  ;;  %v4059_v62 = vld [vmem:[%s4279_s25 + $0x3a0] sm:$0xff]   ;;  %v4060_v63 = vld [vmem:[%s4279_s25 + $0x368] sm:$0xff]  }
 0xace   : > { %v4061_v0 = vld [vmem:[%s4279_s25 + $0x3e8] sm:$0xff]  }
 0xacf   : > { %3788 = vmatpush3.bf16.msra.mxu0 %v4014_v2  ;;  %v4063_v2 = vld [vmem:[%s4279_s25 + $0x3a8] sm:$0xff]  }
 0xad0   : > { %3810 = vmatpush3.bf16.msra.mxu1 %v4015_v3  ;;  %3789 = vmatprep.subr.bf16.mxu0 %v4016_v4  ;;  %v4064_v3 = vld [vmem:[%s4279_s25 + $0x370] sm:$0xff]  }
 0xad1   : > { %3811 = vmatprep.subr.bf16.mxu1 %v4017_v5  ;;  %v4065_v4 = vld [vmem:[%s4279_s25 + $0x3f0] sm:$0xff]  }
 0xad2   : > { %v4066_v5 = vld [vmem:[%s4279_s25 + $0x330] sm:$0xff]  }
 0xad3   : > { %3790 = vmatpush3.bf16.msra.mxu0 %v4018_v6  ;;  %v4067_v6 = vld [vmem:[%s4279_s25 + $0x3b0] sm:$0xff]  }
 0xad4   : > { %3812 = vmatpush3.bf16.msra.mxu1 %v4019_v7  ;;  %3791 = vmatprep.subr.bf16.mxu0 %v4020_v8  ;;  %v4068_v7 = vld [vmem:[%s4279_s25 + $0x378] sm:$0xff]  }
 0xad5   : > { %3813 = vmatprep.subr.bf16.mxu1 %v4021_v9  ;;  %v4069_v8 = vld [vmem:[%s4279_s25 + $0x3f8] sm:$0xff]  }
 0xad6   : > { %v4070_v9 = vld [vmem:[%s4279_s25 + $0x338] sm:$0xff]  }
 0xad7   : > { %3792 = vmatpush3.bf16.msra.mxu0 %v4022_v10  ;;  %v1908_v10 = vmax.f32 %v4528_v21, 0.0 }
 0xad8   : > { %3814 = vmatpush3.bf16.msra.mxu1 %v4023_v13  ;;  %3793 = vmatprep.subr.bf16.mxu0 %v4024_v14  ;;  %v4071_v13 = vld [vmem:[%s4279_s25 + $0x3b8] sm:$0xff]   ;;  %v1910_v14 = vmax.f32 %v4531_v22, 0.0 }
 0xad9   : > { %3815 = vmatprep.subr.bf16.mxu1 %v4025_v15  ;;  %v1924_v15 = vpack.c.bf16 %v1908_v10, %v1908_v10 }
 0xadb   : > { %3794 = vmatpush3.bf16.msra.mxu0 %v4026_v16  ;;  %v1926_v16 = vpack.c.bf16 %v1910_v14, %v1910_v14 }
 0xadc   : > { %3816 = vmatpush3.bf16.msra.mxu1 %v4027_v17  ;;  %3795 = vmatprep.subr.bf16.mxu0 %v4028_v18 }
 0xadd   : > { %3817 = vmatprep.subr.bf16.mxu1 %v4029_v19  ;;  %v3542_v19 = vld [vmem:[%s676_s1] ss:$0 sm:$0xff] }
 0xadf   : > { %3796 = vmatpush3.bf16.msra.mxu0 %v4030_v20 }
 0xae0   : > { %3818 = vmatpush3.bf16.msra.mxu1 %v4031_v25  ;;  %3797 = vmatprep.subr.bf16.mxu0 %v4032_v26 }
 0xae1   : > { %3819 = vmatprep.subr.bf16.mxu1 %v4033_v27 }
 0xae3   : > { %3798 = vmatpush3.bf16.msra.mxu0 %v4034_v55 }
 0xae4   : > { %3820 = vmatpush3.bf16.msra.mxu1 %v4035_v32  ;;  %3799 = vmatprep.subr.bf16.mxu0 %v4036_v33 }
 0xae5   : > { %3821 = vmatprep.subr.bf16.mxu1 %v4037_v34 }
 0xae7   : > { %3800 = vmatpush3.bf16.msra.mxu0 %v4038_v52 }
 0xae8   : > { %3822 = vmatpush3.bf16.msra.mxu1 %v4039_v12  ;;  %3829 = vmatprep.subr.bf16.mxu0 %v4040_v36 }
 0xae9   : > { %3851 = vmatprep.subr.bf16.mxu1 %v4041_v53 }
 0xaea   : > { %3152 = vmatmul.mubr.bf16.vlgmr.msra.gmra.mrb[32].mxu0 %v1920_v24 }
 0xaeb   : > { %3192 = vmatmul.mubr.bf16.vlgmr.msra.gmra.mrb[36].mxu1 %v1922_v39  ;;  %3830 = vmatpush3.bf16.msra.mxu0 %v4042_v23 }
 0xaec   : > { %3231 = vmatprep.mubr.bf16.mxu0 %v1925_v59  ;;  %3852 = vmatpush3.bf16.msra.mxu1 %v4043_v56 }
 0xaed   : > { %3271 = vmatprep.mubr.bf16.mxu1 %v1927_v41  ;;  %3831 = vmatprep.subr.bf16.mxu0 %v4044_v40 }
 0xaee   : > { %3853 = vmatprep.subr.bf16.mxu1 %v4045_v57 }
 0xaef   : > { %3832 = vmatpush3.bf16.msra.mxu0 %v4046_v43 }
 0xaf0   : > { %3854 = vmatpush3.bf16.msra.mxu1 %v4047_v60  ;;  %3833 = vmatprep.subr.bf16.mxu0 %v4048_v44 }
 0xaf1   : > { %3855 = vmatprep.subr.bf16.mxu1 %v4049_v45 }
 0xaf3   : > { %3834 = vmatpush3.bf16.msra.mxu0 %v4050_v46 }
 0xaf4   : > { %3856 = vmatpush3.bf16.msra.mxu1 %v4051_v29  ;;  %3835 = vmatprep.subr.bf16.mxu0 %v4052_v30 }
 0xaf5   : > { %3857 = vmatprep.subr.bf16.mxu1 %v4053_v47 }
 0xaf7   : > { %3836 = vmatpush3.bf16.msra.mxu0 %v4054_v48 }
 0xaf8   : > { %3858 = vmatpush3.bf16.msra.mxu1 %v4055_v49  ;;  %3837 = vmatprep.subr.bf16.mxu0 %v4056_v50 }
 0xaf9   : > { %3859 = vmatprep.subr.bf16.mxu1 %v4057_v51 }
 0xafb   : > { %3838 = vmatpush3.bf16.msra.mxu0 %v4058_v61 }
 0xafc   : > { %3860 = vmatpush3.bf16.msra.mxu1 %v4059_v62  ;;  %3839 = vmatprep.subr.bf16.mxu0 %v4060_v63 }
 0xafd   : > { %3861 = vmatprep.subr.bf16.mxu1 %v4061_v0 }
 0xaff   : > { %3840 = vmatpush3.bf16.msra.mxu0 %v4062_v1 }
 0xb00   : > { %3862 = vmatpush3.bf16.msra.mxu1 %v4063_v2  ;;  %3841 = vmatprep.subr.bf16.mxu0 %v4064_v3 }
 0xb01   : > { %3863 = vmatprep.subr.bf16.mxu1 %v4065_v4 }
 0xb03   : > { %3842 = vmatpush3.bf16.msra.mxu0 %v4066_v5 }
 0xb04   : > { %3864 = vmatpush3.bf16.msra.mxu1 %v4067_v6  ;;  %3843 = vmatprep.subr.bf16.mxu0 %v4068_v7 }
 0xb05   : > { %3865 = vmatprep.subr.bf16.mxu1 %v4069_v8 }
 0xb07   : > { %3844 = vmatpush3.bf16.msra.mxu0 %v4070_v9 }
 0xb08   : > { %3866 = vmatpush3.bf16.msra.mxu1 %v4071_v13 }
 0xb0a   : > { %3232 = vmatmul.mubr.bf16.vlgmr.msra.gmra.mrb[36].mxu0 %v1924_v15  ;;  %v3672_v15 = vld [vmem:[%s682_s0] ss:$0 sm:$0xff] }
 0xb0b   : > { %3272 = vmatmul.mubr.bf16.vlgmr.msra.gmra.mrb[40].mxu1 %v1926_v16 }
 0xb7d   : > { %v3713_v17 = vpop.f32.mrb[24].mxu0  ;;  %v3735_v18 = vpop.f32.mrb[28].mxu1 }
 0xb7e   : > { %v3714_v21 = vpop.f32.mrb[25].mxu0  ;;  %v3736_v20 = vpop.f32.mrb[29].mxu1 }
 0xb7f   : > { %v3715_v25 = vadd.f32 %v3714_v21, %v3713_v17  ;;  %v3737_v26 = vadd.f32 %v3736_v20, %v3735_v18  ;;  %v3716_v27 = vpop.f32.mrb[26].mxu0  ;;  %v3738_v22 = vpop.f32.mrb[30].mxu1 }
 0xb80   : > { %v3717_v28 = vpop.f32.mrb[27].mxu0  ;;  %v3739_v31 = vpop.f32.mrb[31].mxu1 }
 0xb81   : > { %v2994_v55 = vadd.f32 %v3715_v25, %v3542_v19 }
 0xb83   : > { %v3034_v32 = vadd.f32 %v3737_v26, %v2994_v55 }
 0xb9d   : > { %v3757_v33 = vpop.f32.mrb[28].mxu0  ;;  %v3779_v34 = vpop.f32.mrb[32].mxu1 }
 0xb9e   : > { %v3758_v35 = vpop.f32.mrb[29].mxu0  ;;  %v3780_v11 = vpop.f32.mrb[33].mxu1 }
 0xb9f   : > { %v3759_v52 = vadd.f32 %v3758_v35, %v3757_v33  ;;  %v3781_v54 = vadd.f32 %v3780_v11, %v3779_v34  ;;  %v3760_v12 = vpop.f32.mrb[30].mxu0  ;;  %v3782_v36 = vpop.f32.mrb[34].mxu1 }
 0xba0   : > { %v3761_v37 = vpop.f32.mrb[31].mxu0  ;;  %v3783_v53 = vpop.f32.mrb[35].mxu1 }
 0xba1   : > { %v3074_v58 = vadd.f32 %v3759_v52, %v3034_v32 }
 0xba3   : > { %v3114_v38 = vadd.f32 %v3781_v54, %v3074_v58 }
 0xbbd   : > { %v3801_v23 = vpop.f32.mrb[32].mxu0 }
 0xbbe   : > { %v3823_v24 = vpop.f32.mrb[36].mxu1  ;;  %v3802_v56 = vpop.f32.mrb[33].mxu0 }
 0xbbf   : > { %v3803_v39 = vadd.f32 %v3802_v56, %v3801_v23  ;;  %v3824_v40 = vpop.f32.mrb[37].mxu1  ;;  %v3804_v59 = vpop.f32.mrb[34].mxu0 }
 0xbc0   : > { %v3825_v57 = vadd.f32 %v3824_v40, %v3823_v24  ;;  %v3826_v41 = vpop.f32.mrb[38].mxu1  ;;  %v3805_v43 = vpop.f32.mrb[35].mxu0 }
 0xbc1   : > { %v3154_v60 = vadd.f32 %v3803_v39, %v3114_v38  ;;  %v3827_v44 = vpop.f32.mrb[39].mxu1 }
 0xbc3   : > { %v3194_v45 = vadd.f32 %v3825_v57, %v3154_v60 }
 0xbdd   : > { %v3845_v46 = vpop.f32.mrb[36].mxu0 }
 0xbde   : > { %v3867_v29 = vpop.f32.mrb[40].mxu1  ;;  %v3846_v30 = vpop.f32.mrb[37].mxu0 }
 0xbdf   : > { %v3847_v47 = vadd.f32 %v3846_v30, %v3845_v46  ;;  %v3868_v48 = vpop.f32.mrb[41].mxu1  ;;  %v3848_v49 = vpop.f32.mrb[38].mxu0 }
 0xbe0   : > { %v3869_v50 = vadd.f32 %v3868_v48, %v3867_v29  ;;  %v3870_v51 = vpop.f32.mrb[42].mxu1  ;;  %v3849_v61 = vpop.f32.mrb[39].mxu0 }
 0xbe1   : > { %v3234_v62 = vadd.f32 %v3847_v47, %v3194_v45  ;;  %v3871_v63 = vpop.f32.mrb[43].mxu1 }
 0xbe3   : > { %v3274_v0 = vadd.f32 %v3869_v50, %v3234_v62 }
 0xbe5   : > { %v3279_v1 = vadd.f32 %v3274_v0, %v4384_v42  ;;  %v3671_v42 = vld [vmem:[%s679_s4] ss:$0 sm:$0xff] }
 0xbe7   : > { %v3282_v2 = vsel %vm810_vm5, %v3279_v1, 0.0 }
 0xbe8   : > { %3283 = vadd.xlane.f32.xlu1 %v3282_v2 }
 0xc75   : > { %v3284_v3 = vpop.xlane.xlu1 %3283 }
 0xc76   : > { %v3285_v4 = vmul.f32 0.03125, %v3284_v3 }
 0xc78   : > { %v3286_v5 = vsub.f32 %v3279_v1, %v3285_v4 }
 0xc7a   : > { %v3287_v6 = vmul.f32 %v3286_v5, %v3286_v5 }
 0xc7c   : > { %v3288_v7 = vsel %vm810_vm5, %v3287_v6, 0.0 }
 0xc7d   : > { %3289 = vadd.xlane.f32.xlu1 %v3288_v7 }
 0xd0a   : > { %v3290_v8 = vpop.xlane.xlu1 %3289 }
 0xd0b   : > { %v3291_v9 = vmul.f32 0.03125, %v3290_v8 }
 0xd0d   : > { %v3292_v10 = vadd.f32 1e-05, %v3291_v9 }
 0xd0f   : > { %4082 = vrsqrt.f32 %v3292_v10 }
 0xd19   : > { %v4083_v13 = vpop.eup %4082 }
 0xd1a   : > { %v3294_v14 = vmul.f32 %v4083_v13, %v3286_v5 }
 0xd1c   : > { %v3301_v16 = vmul.f32 %v3671_v42, %v3294_v14 }
 0xd1e   : > { %v3308_v17 = vadd.f32 %v3672_v15, %v3301_v16 }
 0xd20   : > { %3309 = vst.msk [vmem:[#allocation2] sm:$0xff] %vm810_vm5, %v3308_v17  ;;  %3310 = vst.msk [vmem:[#allocation3] sm:$0xff] %vm810_vm5, %v3308_v17 }
 0xd21   : > { %4097 = shalt.err (!%p4094_p12)
}
 0xd22   : > { %s4719_s0 = sld [smem:[#allocation13_spill]] }
 0xd28   : > { %s4098_s29 = scalar_lea.hbm %s4719_s0, 128 }
 0xd29   : > { %p4099_p13 = scmp.ne.s32.totalorder %s4719_s0, %s4098_s29  ;;  %p4104_p2 = scmp.lt.u32.totalorder %s4098_s29, %s4719_s0 }
 0xd2b   : > { %p4100_p0 = pnand %p4099_p13, %p3918_p5 }
 0xd2d   : > { %p4101_p1 = pneg %p4100_p0 }
 0xd2f   : > { %p4106_p3 = pnand %p4104_p2, %p4101_p1 }
 0xd31   : > { %4109 = shalt.err (!%p4106_p3)
}
 0xd32   : > { %3915 = dma.vmem_to_hbm [thread:$0]  (%p3918_p5), %s3319_s26, 128, %s4719_s0, [#allocation4]  }
 0xd33   : > { %4115 = dma.done.wait (%p3918_p5), [#allocation4], 128  }
 0xd34   : > { %4117 = vsyncadd (%p3918_p5), [#allocation4], 4294967168 }
 0xd35 PF: > { %s4720_s19 = sld [smem:[#allocation6_spill]] }
 0xd3b   : > { %s27_s21 = sadd.s32 1, %s4720_s19  }
 0xd3c   : > { %p24_p4 = scmp.ge.s32.totalorder %s27_s21, 4  }
 0xd3e   :  { %26 = sbr.rel (!%p24_p4) target bundleno = 9 (0x9), region = 148 }
 0xd45   :  { %3331 = vsyncpa [#allocation4], 1 }
 0xd46   :  { %3333 = vsyncpa [#allocation4 + $0x1], 1 }

</bundles_post_ra>
